<compile_context>
chip_gen: v7x
topology: tpu7x:2x2x1
jax: 0.10.0
libtpu: 0.0.40
codegen_flags: <defaults>
</compile_context>

<pallas_src>
import functools
import math

import jax
import jax.numpy as jnp
from jax import lax
from jax.experimental import pallas as pl
from jax.experimental.pallas import tpu as pltpu


def _round_up(v, m):
    return (v + m - 1) // m * m


def _ppr_kernel(xq_ref, xk_ref, w1q_ref, w1k_ref, b1_ref, w2_ref, b2_ref,
                w3_ref, b3_ref, w4_ref, b4_ref, o_ref,
                max_acc, sum_acc, *, n_keys, tk, mm_dtype):
    k_step = pl.program_id(2)
    n_k_steps = pl.num_programs(2)

    xq = xq_ref[...]                       # [Bb, TQ, Cp]
    xk = xk_ref[...]                       # [Bb, TK, Cp]
    Bb, TQ, Cp = xq.shape
    TK = xk.shape[1]
    Co = w2_ref.shape[-1]

    @pl.when(k_step == 0)
    def _init():
        # Post-ReLU values are >= 0, and padded key rows are masked to 0 below,
        # so 0 is a valid identity for the running max as well as the sum.
        max_acc[...] = jnp.zeros_like(max_acc)
        sum_acc[...] = jnp.zeros_like(sum_acc)

    # First pairwise Linear, algebraically split across query / key rows:
    #   [x_i, x_j - x_i] @ W1 = x_i @ (W1q - W1k) + x_j @ W1k  (+ b1)
    # Split + zero-padding of the K=3 contraction to 8 happens once in the
    # wrapper, so these are plain lane-dense MXU dots here.
    a_q = jnp.dot(xq.reshape(Bb * TQ, Cp), w1q_ref[...],
                  preferred_element_type=jnp.float32) + b1_ref[...]
    a_k = jnp.dot(xk.reshape(Bb * TK, Cp), w1k_ref[...],
                  preferred_element_type=jnp.float32)

    # Pairwise pre-activation for this key tile only:
    #   h1[b,i,j,:] = relu(a_q[b,i,:] + a_k[b,j,:])
    h1 = jnp.maximum(
        a_q.reshape(Bb, TQ, 1, Co) + a_k.reshape(Bb, 1, TK, Co), 0.0)

    # Second pairwise Linear as ONE flat MXU matmul per tile; w2 is
    # weight-stationary (constant index_map keeps it VMEM-resident).
    # TK is a multiple of 8 so this reshape is a free layout collapse.
    h1f = h1.reshape(Bb * TQ * TK, Co).astype(mm_dtype)
    h2f = jnp.maximum(
        jnp.dot(h1f, w2_ref[...].astype(mm_dtype),
                preferred_element_type=jnp.float32) + b2_ref[...], 0.0)
    h2 = h2f.reshape(Bb, TQ, TK, Co)

    # Mask key rows that are N-padding (static no-op when N % TK == 0).
    if n_keys % tk != 0:
        key_idx = k_step * TK + lax.broadcasted_iota(
            jnp.int32, (1, 1, TK, 1), 2)
        h2 = jnp.where(key_idx < n_keys, h2, 0.0)

    # Fold this tile into the running accumulators; the full [B,N,N,Co]
    # pairwise tensor never exists.
    max_acc[...] = jnp.maximum(max_acc[...], jnp.max(h2, axis=2))
    sum_acc[...] = sum_acc[...] + jnp.sum(h2, axis=2)

    @pl.when(k_step == n_k_steps - 1)
    def _finalize():
        p_max = max_acc[...].reshape(Bb * TQ, Co)
        p_avg = (sum_acc[...] * (1.0 / n_keys)).reshape(Bb * TQ, Co)
        # max for channels < Co/2, mean for channels >= Co/2 (lane-mask select
        # instead of mid-lane slices + lane concat).
        lane = lax.broadcasted_iota(jnp.int32, (Bb * TQ, Co), 1)
        feat = jnp.where(lane < Co // 2, p_max, p_avg)

        # out_fc: Linear(Co,16) -> ReLU -> Dropout (identity in eval)
        #         -> Linear(16,2) -> LogSoftmax
        # TODO(synk): Dropout(0.5) has no train-mode equivalent here; eval-mode
        # identity is implemented (matches module.eval()).
        h3 = jnp.maximum(
            jnp.dot(feat, w3_ref[...], preferred_element_type=jnp.float32)
            + b3_ref[...], 0.0)
        logits = (jnp.dot(h3, w4_ref[...], preferred_element_type=jnp.float32)
                  + b4_ref[...])                       # [Bb*TQ, 2]

        # Closed-form 2-class log-softmax: lse = l0 + softplus(l1 - l0).
        d = logits[:, 1:2] - logits[:, 0:1]
        softplus = jnp.maximum(d, 0.0) + jnp.log(1.0 + jnp.exp(-jnp.abs(d)))
        lse = logits[:, 0:1] + softplus
        o_ref[...] = (logits - lse).reshape(Bb, TQ, 2).astype(o_ref.dtype)


@functools.partial(jax.jit, static_argnames=("batch_block", "q_tile", "k_tile",
                                              "use_bf16_matmul"))
def point_pairwise_relation_net(x, w1, b1, w2, b2, w3, b3, w4, b4,
                                batch_block=1, q_tile=None, k_tile=None,
                                use_bf16_matmul=False):
    B, N, C = x.shape
    Co = w2.shape[-1]

    # ---- tile selection --------------------------------------------------
    # Default 128x128 query/key tiles: h1+h2 tiles ~= 8 MiB f32 (<< v7x's
    # 64 MiB physical VMEM even double-buffered) while M = Bb*TQ*TK = 16K rows
    # keeps the 64-wide MXU contraction amortized. batch_block=1 keeps the
    # parallel grid extent >= B so v7x's two TensorCores both get work.
    Bb = batch_block if (batch_block is not None and B % batch_block == 0) else 1
    TQ = q_tile if q_tile is not None else min(_round_up(N, 8), 128)
    TK = k_tile if k_tile is not None else min(_round_up(N, 8), 128)
    TQ = _round_up(TQ, 8)
    TK = _round_up(TK, 8)
    N_pad = _round_up(N, math.lcm(TQ, TK))

    # ---- operand prep (runs once in XLA; everything here is tiny) ---------
    Cp = _round_up(C, 8)                    # pad the K=3 contraction to 8
    w1_k = w1[C:, :]
    w1_q = w1[:C, :] - w1_k                 # split-Linear algebra (rela=True)
    pad_k = ((0, Cp - C), (0, 0))
    w1_q = jnp.pad(w1_q, pad_k)
    w1_k = jnp.pad(w1_k, pad_k)
    x_pad = jnp.pad(x, ((0, 0), (0, N_pad - N), (0, Cp - C)))

    mm_dtype = jnp.bfloat16 if use_bf16_matmul else jnp.float32

    # ---- VMEM budget for the compiler (don't rely on scoped defaults) -----
    f32b = 4
    mmb = 2 if use_bf16_matmul else 4
    tile_rows = Bb * TQ * TK
    weights_bytes = (w1_q.size + w1_k.size + b1.size + w2.size + b2.size
                     + w3.size + b3.size + w4.size + b4.size) * f32b
    est = (2 * 2 * Bb * (TQ + TK) * Cp * f32b          # double-buffered x tiles
           + tile_rows * Co * (2 * f32b + mmb)          # h1, h2, matmul-input copy
           + 2 * Bb * TQ * Co * f32b                    # max / sum accumulators
           + 2 * weights_bytes                          # resident weights
           + 2 * Bb * TQ * 2 * f32b)                    # output tile
    vmem_limit = int(min(max(int(est * 1.5) + (4 << 20), 32 << 20), 96 << 20))

    grid = (B // Bb, N_pad // TQ, N_pad // TK)
    const = lambda a: pl.BlockSpec(a.shape, lambda b, q, k: (0,) * a.ndim)

    kernel = functools.partial(_ppr_kernel, n_keys=N, tk=TK, mm_dtype=mm_dtype)

    out = pl.pallas_call(
        kernel,
        out_shape=jax.ShapeDtypeStruct((B, N_pad, 2), jnp.float32),
        grid_spec=pltpu.PrefetchScalarGridSpec(
            num_scalar_prefetch=0,
            grid=grid,
            in_specs=[
                pl.BlockSpec((Bb, TQ, Cp), lambda b, q, k: (b, q, 0)),  # queries
                pl.BlockSpec((Bb, TK, Cp), lambda b, q, k: (b, k, 0)),  # keys
                const(w1_q), const(w1_k), const(b1),
                const(w2), const(b2),
                const(w3), const(b3),
                const(w4), const(b4),
            ],
            out_specs=pl.BlockSpec((Bb, TQ, 2), lambda b, q, k: (b, q, 0)),
            scratch_shapes=[
                pltpu.VMEM((Bb, TQ, Co), jnp.float32),   # running max
                pltpu.VMEM((Bb, TQ, Co), jnp.float32),   # running sum
            ],
        ),
        compiler_params=pltpu.CompilerParams(
            dimension_semantics=("parallel", "parallel", "arbitrary"),
            vmem_limit_bytes=vmem_limit),
    )(x_pad, x_pad, w1_q, w1_k, b1, w2, b2, w3, b3, w4, b4)

    return out[:, :N, :]


def ref_forward(x, w1, b1, w2, b2, w3, b3, w4, b4):
    """Pure-JAX reference matching the PyTorch module (eval mode)."""
    B, N, C = x.shape
    xq = x[:, :, None, :]
    xk = x[:, None, :, :]
    feat = jnp.concatenate(
        [jnp.broadcast_to(xq, (B, N, N, C)),
         jnp.broadcast_to(xk - xq, (B, N, N, C))], axis=-1)
    h1 = jax.nn.relu(feat @ w1 + b1[0])
    h2 = jax.nn.relu(h1 @ w2 + b2[0])
    Co = w2.shape[-1]
    half = Co // 2
    pw = jnp.concatenate([jnp.max(h2[..., :half], axis=2),
                          jnp.mean(h2[..., half:], axis=2)], axis=-1)
    h3 = jax.nn.relu(pw @ w3 + b3[0])
    logits = h3 @ w4 + b4[0]
    return jax.nn.log_softmax(logits, axis=-1)


if __name__ == "__main__":
    B, N, C = 2, 16, 3          # module fixes C=3 (point coords)
    Cgf = 16 * 4                # Co = 64

    key = jax.random.PRNGKey(0)
    kx, kp = jax.random.split(key)
    x = jax.random.normal(kx, (B, N, C), dtype=jnp.float32)

    # Deterministic parameter init (synthetic weights, not a checkpoint).
    ks = jax.random.split(kp, 8)
    init = lambda k, shp, scale: (scale * jax.random.normal(k, shp)).astype(jnp.float32)
    w1 = init(ks[0], (2 * C, Cgf), 0.3)   # pw_net.fc[0]: Linear(2C, Cgf)
    b1 = init(ks[1], (1, Cgf), 0.1)
    w2 = init(ks[2], (Cgf, Cgf), 0.1)     # pw_net.fc[2]: Linear(Cgf, Cgf)
    b2 = init(ks[3], (1, Cgf), 0.1)
    w3 = init(ks[4], (Cgf, 16), 0.1)      # out_fc[0]: Linear(Cgf, 16)
    b3 = init(ks[5], (1, 16), 0.1)
    w4 = init(ks[6], (16, 2), 0.3)        # out_fc[3]: Linear(16, 2)
    b4 = init(ks[7], (1, 2), 0.1)

    # 1) Default path (single key step per (batch, query-tile)).
    out = jax.block_until_ready(
        point_pairwise_relation_net(x, w1, b1, w2, b2, w3, b3, w4, b4))
    ref = jax.block_until_ready(ref_forward(x, w1, b1, w2, b2, w3, b3, w4, b4))
    assert out.shape == (B, N, 2) and out.dtype == jnp.float32
    assert jnp.allclose(out, ref, atol=1e-4, rtol=1e-4), \
        f"max abs err {jnp.max(jnp.abs(out - ref))}"

    # 2) Streamed multi-tile path with key padding: N=12 -> padded to 16,
    #    2 query tiles x 2 key tiles, exercises the running max/sum
    #    accumulators and the masked mean/max over padded key rows.
    x12 = x[:, :12, :]
    out12 = jax.block_until_ready(
        point_pairwise_relation_net(x12, w1, b1, w2, b2, w3, b3, w4, b4,
                                    q_tile=8, k_tile=8))
    ref12 = jax.block_until_ready(
        ref_forward(x12, w1, b1, w2, b2, w3, b3, w4, b4))
    assert out12.shape == (B, 12, 2)
    assert jnp.allclose(out12, ref12, atol=1e-4, rtol=1e-4), \
        f"max abs err {jnp.max(jnp.abs(out12 - ref12))}"

    print("KERNEL_OK")
</pallas_src>

<mosaic_0001>
module attributes {stable_mosaic.version = 11 : i64} {
  func.func @_ppr_kernel(%arg0: i32, %arg1: i32, %arg2: i32, %arg3: memref<1x16x8xf32, #tpu.memory_space<vmem>>, %arg4: memref<1x16x8xf32, #tpu.memory_space<vmem>>, %arg5: memref<8x64xf32, #tpu.memory_space<vmem>>, %arg6: memref<8x64xf32, #tpu.memory_space<vmem>>, %arg7: memref<1x64xf32, #tpu.memory_space<vmem>>, %arg8: memref<64x64xf32, #tpu.memory_space<vmem>>, %arg9: memref<1x64xf32, #tpu.memory_space<vmem>>, %arg10: memref<64x16xf32, #tpu.memory_space<vmem>>, %arg11: memref<1x16xf32, #tpu.memory_space<vmem>>, %arg12: memref<16x2xf32, #tpu.memory_space<vmem>>, %arg13: memref<1x2xf32, #tpu.memory_space<vmem>>, %arg14: memref<1x16x2xf32, #tpu.memory_space<vmem>>, %arg15: memref<1x16x64xf32, #tpu.memory_space<vmem>>, %arg16: memref<1x16x64xf32, #tpu.memory_space<vmem>>) attributes {dimension_semantics = [#tpu.dimension_semantics<parallel>, #tpu.dimension_semantics<parallel>, #tpu.dimension_semantics<arbitrary>], iteration_bounds = array<i64: 2, 1, 1>, scalar_prefetch = 0 : i64, scratch_operands = 2 : i64, tpu.core_type = #tpu.core_type<tc>, window_params = [{transform_indices = @transform_0, window_bounds = array<i64: 1, 16, 8>}, {transform_indices = @transform_1, window_bounds = array<i64: 1, 16, 8>}, {pipeline_mode = #tpu.pipeline_mode<synchronous>, transform_indices = @transform_2, window_bounds = array<i64: 8, 64>}, {pipeline_mode = #tpu.pipeline_mode<synchronous>, transform_indices = @transform_3, window_bounds = array<i64: 8, 64>}, {pipeline_mode = #tpu.pipeline_mode<synchronous>, transform_indices = @transform_4, window_bounds = array<i64: 1, 64>}, {pipeline_mode = #tpu.pipeline_mode<synchronous>, transform_indices = @transform_5, window_bounds = array<i64: 64, 64>}, {pipeline_mode = #tpu.pipeline_mode<synchronous>, transform_indices = @transform_6, window_bounds = array<i64: 1, 64>}, {pipeline_mode = #tpu.pipeline_mode<synchronous>, transform_indices = @transform_7, window_bounds = array<i64: 64, 16>}, {pipeline_mode = #tpu.pipeline_mode<synchronous>, transform_indices = @transform_8, window_bounds = array<i64: 1, 16>}, {pipeline_mode = #tpu.pipeline_mode<synchronous>, transform_indices = @transform_9, window_bounds = array<i64: 16, 2>}, {pipeline_mode = #tpu.pipeline_mode<synchronous>, transform_indices = @transform_10, window_bounds = array<i64: 1, 2>}, {transform_indices = @transform_11, window_bounds = array<i64: 1, 16, 2>}]} {
    %c0 = arith.constant 0 : index
    %c0_0 = arith.constant 0 : index
    %c0_1 = arith.constant 0 : index
    %0 = vector.load %arg3[%c0, %c0_0, %c0_1] : memref<1x16x8xf32, #tpu.memory_space<vmem>>, vector<1x16x8xf32>
    %c0_2 = arith.constant 0 : index
    %c0_3 = arith.constant 0 : index
    %c0_4 = arith.constant 0 : index
    %1 = vector.load %arg4[%c0_2, %c0_3, %c0_4] : memref<1x16x8xf32, #tpu.memory_space<vmem>>, vector<1x16x8xf32>
    %c0_i32 = arith.constant 0 : i32
    %2 = arith.cmpi eq, %arg2, %c0_i32 : i32
    %3 = arith.extui %2 : i1 to i32
    %c0_i32_5 = arith.constant 0 : i32
    %4 = arith.cmpi ne, %3, %c0_i32_5 : i32
    scf.if %4 {
      %cst_36 = arith.constant 0.000000e+00 : f32
      %41 = vector.broadcast %cst_36 : f32 to vector<1x16x64xf32>
      %c0_37 = arith.constant 0 : index
      %c0_38 = arith.constant 0 : index
      %c0_39 = arith.constant 0 : index
      %42 = vector.load %arg15[%c0_37, %c0_38, %c0_39] : memref<1x16x64xf32, #tpu.memory_space<vmem>>, vector<1x16x64xf32>
      tpu.vector_store %arg15[%c0_37, %c0_38, %c0_39], %41 {strides = array<i32>} : memref<1x16x64xf32, #tpu.memory_space<vmem>>, vector<1x16x64xf32>,
      %cst_40 = arith.constant 0.000000e+00 : f32
      %43 = vector.broadcast %cst_40 : f32 to vector<1x16x64xf32>
      %c0_41 = arith.constant 0 : index
      %c0_42 = arith.constant 0 : index
      %c0_43 = arith.constant 0 : index
      %44 = vector.load %arg16[%c0_41, %c0_42, %c0_43] : memref<1x16x64xf32, #tpu.memory_space<vmem>>, vector<1x16x64xf32>
      tpu.vector_store %arg16[%c0_41, %c0_42, %c0_43], %43 {strides = array<i32>} : memref<1x16x64xf32, #tpu.memory_space<vmem>>, vector<1x16x64xf32>,
    } else {
    }
    %5 = vector.shape_cast %0 : vector<1x16x8xf32> to vector<16x8xf32>
    %c0_6 = arith.constant 0 : index
    %c0_7 = arith.constant 0 : index
    %6 = vector.load %arg5[%c0_6, %c0_7] : memref<8x64xf32, #tpu.memory_space<vmem>>, vector<8x64xf32>
    %cst = arith.constant dense<0.000000e+00> : vector<16x64xf32>
    %7 = tpu.matmul %5, %6, %cst {dimension_numbers = #tpu.dot_dimension_numbers<[1], [0], [0], [1], [0, 0, 1, 1], [], []>} : vector<16x8xf32>, vector<8x64xf32>, vector<16x64xf32> -> vector<16x64xf32>
    %c0_8 = arith.constant 0 : index
    %c0_9 = arith.constant 0 : index
    %8 = vector.load %arg7[%c0_8, %c0_9] : memref<1x64xf32, #tpu.memory_space<vmem>>, vector<1x64xf32>
    %9 = vector.broadcast %8 : vector<1x64xf32> to vector<16x64xf32>
    %10 = arith.addf %7, %9 : vector<16x64xf32>
    %11 = vector.shape_cast %1 : vector<1x16x8xf32> to vector<16x8xf32>
    %c0_10 = arith.constant 0 : index
    %c0_11 = arith.constant 0 : index
    %12 = vector.load %arg6[%c0_10, %c0_11] : memref<8x64xf32, #tpu.memory_space<vmem>>, vector<8x64xf32>
    %cst_12 = arith.constant dense<0.000000e+00> : vector<16x64xf32>
    %13 = tpu.matmul %11, %12, %cst_12 {dimension_numbers = #tpu.dot_dimension_numbers<[1], [0], [0], [1], [0, 0, 1, 1], [], []>} : vector<16x8xf32>, vector<8x64xf32>, vector<16x64xf32> -> vector<16x64xf32>
    %14 = vector.shape_cast %10 : vector<16x64xf32> to vector<1x16x1x64xf32>
    %15 = vector.shape_cast %13 : vector<16x64xf32> to vector<1x1x16x64xf32>
    %16 = vector.broadcast %14 : vector<1x16x1x64xf32> to vector<1x16x16x64xf32>
    %17 = vector.broadcast %15 : vector<1x1x16x64xf32> to vector<1x16x16x64xf32>
    %18 = arith.addf %16, %17 : vector<1x16x16x64xf32>
    %cst_13 = arith.constant 0.000000e+00 : f32
    %19 = vector.broadcast %cst_13 : f32 to vector<1x16x16x64xf32>
    %20 = arith.maximumf %18, %19 : vector<1x16x16x64xf32>
    %21 = vector.shape_cast %20 : vector<1x16x16x64xf32> to vector<256x64xf32>
    %c0_14 = arith.constant 0 : index
    %c0_15 = arith.constant 0 : index
    %22 = vector.load %arg8[%c0_14, %c0_15] : memref<64x64xf32, #tpu.memory_space<vmem>>, vector<64x64xf32>
    %cst_16 = arith.constant dense<0.000000e+00> : vector<256x64xf32>
    %23 = tpu.matmul %21, %22, %cst_16 {dimension_numbers = #tpu.dot_dimension_numbers<[1], [0], [0], [1], [0, 0, 1, 1], [], []>} : vector<256x64xf32>, vector<64x64xf32>, vector<256x64xf32> -> vector<256x64xf32>
    %c0_17 = arith.constant 0 : index
    %c0_18 = arith.constant 0 : index
    %24 = vector.load %arg9[%c0_17, %c0_18] : memref<1x64xf32, #tpu.memory_space<vmem>>, vector<1x64xf32>
    %25 = vector.broadcast %24 : vector<1x64xf32> to vector<256x64xf32>
    %26 = arith.addf %23, %25 : vector<256x64xf32>
    %cst_19 = arith.constant 0.000000e+00 : f32
    %27 = vector.broadcast %cst_19 : f32 to vector<256x64xf32>
    %28 = arith.maximumf %26, %27 : vector<256x64xf32>
    %29 = vector.shape_cast %28 : vector<256x64xf32> to vector<1x16x16x64xf32>
    %c0_20 = arith.constant 0 : index
    %c0_21 = arith.constant 0 : index
    %c0_22 = arith.constant 0 : index
    %30 = vector.load %arg15[%c0_20, %c0_21, %c0_22] : memref<1x16x64xf32, #tpu.memory_space<vmem>>, vector<1x16x64xf32>
    %cst_23 = arith.constant dense<0xFF800000> : vector<1x16x64xf32>
    %31 = vector.multi_reduction <maximumf>, %29, %cst_23 [2] : vector<1x16x16x64xf32> to vector<1x16x64xf32>
    %32 = arith.maximumf %30, %31 : vector<1x16x64xf32>
    %c0_24 = arith.constant 0 : index
    %c0_25 = arith.constant 0 : index
    %c0_26 = arith.constant 0 : index
    %33 = vector.load %arg15[%c0_24, %c0_25, %c0_26] : memref<1x16x64xf32, #tpu.memory_space<vmem>>, vector<1x16x64xf32>
    tpu.vector_store %arg15[%c0_24, %c0_25, %c0_26], %32 {strides = array<i32>} : memref<1x16x64xf32, #tpu.memory_space<vmem>>, vector<1x16x64xf32>,
    %c0_27 = arith.constant 0 : index
    %c0_28 = arith.constant 0 : index
    %c0_29 = arith.constant 0 : index
    %34 = vector.load %arg16[%c0_27, %c0_28, %c0_29] : memref<1x16x64xf32, #tpu.memory_space<vmem>>, vector<1x16x64xf32>
    %cst_30 = arith.constant dense<0.000000e+00> : vector<1x16x64xf32>
    %35 = vector.multi_reduction <add>, %29, %cst_30 [2] : vector<1x16x16x64xf32> to vector<1x16x64xf32>
    %36 = arith.addf %34, %35 : vector<1x16x64xf32>
    %c0_31 = arith.constant 0 : index
    %c0_32 = arith.constant 0 : index
    %c0_33 = arith.constant 0 : index
    %37 = vector.load %arg16[%c0_31, %c0_32, %c0_33] : memref<1x16x64xf32, #tpu.memory_space<vmem>>, vector<1x16x64xf32>
    tpu.vector_store %arg16[%c0_31, %c0_32, %c0_33], %36 {strides = array<i32>} : memref<1x16x64xf32, #tpu.memory_space<vmem>>, vector<1x16x64xf32>,
    %c0_i32_34 = arith.constant 0 : i32
    %38 = arith.cmpi eq, %arg2, %c0_i32_34 : i32
    %39 = arith.extui %38 : i1 to i32
    %c0_i32_35 = arith.constant 0 : i32
    %40 = arith.cmpi ne, %39, %c0_i32_35 : i32
    scf.if %40 {
      %c0_36 = arith.constant 0 : index
      %c0_37 = arith.constant 0 : index
      %c0_38 = arith.constant 0 : index
      %41 = vector.load %arg15[%c0_36, %c0_37, %c0_38] : memref<1x16x64xf32, #tpu.memory_space<vmem>>, vector<1x16x64xf32>
      %42 = vector.shape_cast %41 : vector<1x16x64xf32> to vector<16x64xf32>
      %c0_39 = arith.constant 0 : index
      %c0_40 = arith.constant 0 : index
      %c0_41 = arith.constant 0 : index
      %43 = vector.load %arg16[%c0_39, %c0_40, %c0_41] : memref<1x16x64xf32, #tpu.memory_space<vmem>>, vector<1x16x64xf32>
      %cst_42 = arith.constant 6.250000e-02 : f32
      %44 = vector.broadcast %cst_42 : f32 to vector<1x16x64xf32>
      %45 = arith.mulf %43, %44 : vector<1x16x64xf32>
      %46 = vector.shape_cast %45 : vector<1x16x64xf32> to vector<16x64xf32>
      %47 = tpu.iota {dimensions = array<i32: 1>} : vector<16x64xi32>
      %c32_i32 = arith.constant 32 : i32
      %48 = vector.broadcast %c32_i32 : i32 to vector<16x64xi32>
      %49 = arith.cmpi slt, %47, %48 : vector<16x64xi32>
      %50 = arith.select %49, %42, %46 : vector<16x64xi1>, vector<16x64xf32>
      %c0_43 = arith.constant 0 : index
      %c0_44 = arith.constant 0 : index
      %51 = vector.load %arg10[%c0_43, %c0_44] : memref<64x16xf32, #tpu.memory_space<vmem>>, vector<64x16xf32>
      %cst_45 = arith.constant dense<0.000000e+00> : vector<16x16xf32>
      %52 = tpu.matmul %50, %51, %cst_45 {dimension_numbers = #tpu.dot_dimension_numbers<[1], [0], [0], [1], [0, 0, 1, 1], [], []>} : vector<16x64xf32>, vector<64x16xf32>, vector<16x16xf32> -> vector<16x16xf32>
      %c0_46 = arith.constant 0 : index
      %c0_47 = arith.constant 0 : index
      %53 = vector.load %arg11[%c0_46, %c0_47] : memref<1x16xf32, #tpu.memory_space<vmem>>, vector<1x16xf32>
      %54 = vector.broadcast %53 : vector<1x16xf32> to vector<16x16xf32>
      %55 = arith.addf %52, %54 : vector<16x16xf32>
      %cst_48 = arith.constant 0.000000e+00 : f32
      %56 = vector.broadcast %cst_48 : f32 to vector<16x16xf32>
      %57 = arith.maximumf %55, %56 : vector<16x16xf32>
      %c0_49 = arith.constant 0 : index
      %c0_50 = arith.constant 0 : index
      %58 = vector.load %arg12[%c0_49, %c0_50] : memref<16x2xf32, #tpu.memory_space<vmem>>, vector<16x2xf32>
      %cst_51 = arith.constant dense<0.000000e+00> : vector<16x2xf32>
      %59 = tpu.matmul %57, %58, %cst_51 {dimension_numbers = #tpu.dot_dimension_numbers<[1], [0], [0], [1], [0, 0, 1, 1], [], []>} : vector<16x16xf32>, vector<16x2xf32>, vector<16x2xf32> -> vector<16x2xf32>
      %c0_52 = arith.constant 0 : index
      %c0_53 = arith.constant 0 : index
      %60 = vector.load %arg13[%c0_52, %c0_53] : memref<1x2xf32, #tpu.memory_space<vmem>>, vector<1x2xf32>
      %61 = vector.broadcast %60 : vector<1x2xf32> to vector<16x2xf32>
      %62 = arith.addf %59, %61 : vector<16x2xf32>
      %63 = vector.extract_strided_slice %62 {offsets = [0, 1], sizes = [16, 1], strides = [1, 1]} : vector<16x2xf32> to vector<16x1xf32>
      %64 = vector.extract_strided_slice %62 {offsets = [0, 0], sizes = [16, 1], strides = [1, 1]} : vector<16x2xf32> to vector<16x1xf32>
      %65 = arith.subf %63, %64 : vector<16x1xf32>
      %cst_54 = arith.constant 0.000000e+00 : f32
      %66 = vector.broadcast %cst_54 : f32 to vector<16x1xf32>
      %67 = arith.maximumf %65, %66 : vector<16x1xf32>
      %68 = math.absf %65 : vector<16x1xf32>
      %cst_55 = arith.constant 0.000000e+00 : f32
      %69 = vector.broadcast %cst_55 : f32 to vector<16x1xf32>
      %70 = arith.subf %69, %68 : vector<16x1xf32>
      %71 = math.exp %70 : vector<16x1xf32>
      %cst_56 = arith.constant 1.000000e+00 : f32
      %72 = vector.broadcast %cst_56 : f32 to vector<16x1xf32>
      %73 = arith.addf %72, %71 : vector<16x1xf32>
      %74 = math.log %73 : vector<16x1xf32>
      %75 = arith.addf %67, %74 : vector<16x1xf32>
      %76 = vector.extract_strided_slice %62 {offsets = [0, 0], sizes = [16, 1], strides = [1, 1]} : vector<16x2xf32> to vector<16x1xf32>
      %77 = arith.addf %76, %75 : vector<16x1xf32>
      %78 = vector.broadcast %77 : vector<16x1xf32> to vector<16x2xf32>
      %79 = arith.subf %62, %78 : vector<16x2xf32>
      %80 = vector.shape_cast %79 : vector<16x2xf32> to vector<1x16x2xf32>
      %c0_57 = arith.constant 0 : index
      %c0_58 = arith.constant 0 : index
      %c0_59 = arith.constant 0 : index
      %81 = vector.load %arg14[%c0_57, %c0_58, %c0_59] : memref<1x16x2xf32, #tpu.memory_space<vmem>>, vector<1x16x2xf32>
      tpu.vector_store %arg14[%c0_57, %c0_58, %c0_59], %80 {strides = array<i32>} : memref<1x16x2xf32, #tpu.memory_space<vmem>>, vector<1x16x2xf32>,
    } else {
    }
    return
  }
  func.func @transform_0(%arg0: i32, %arg1: i32, %arg2: i32) -> (i32, i32, i32) {
    %c0_i32 = arith.constant 0 : i32
    %c0_i32_0 = arith.constant 0 : i32
    return %arg0, %arg1, %c0_i32 : i32, i32, i32
  }
  func.func @transform_1(%arg0: i32, %arg1: i32, %arg2: i32) -> (i32, i32, i32) {
    %c0_i32 = arith.constant 0 : i32
    %c0_i32_0 = arith.constant 0 : i32
    return %arg0, %arg2, %c0_i32 : i32, i32, i32
  }
  func.func @transform_2(%arg0: i32, %arg1: i32, %arg2: i32) -> (i32, i32) {
    %c0_i32 = arith.constant 0 : i32
    %c0_i32_0 = arith.constant 0 : i32
    %c0_i32_1 = arith.constant 0 : i32
    return %c0_i32, %c0_i32_0 : i32, i32
  }
  func.func @transform_3(%arg0: i32, %arg1: i32, %arg2: i32) -> (i32, i32) {
    %c0_i32 = arith.constant 0 : i32
    %c0_i32_0 = arith.constant 0 : i32
    %c0_i32_1 = arith.constant 0 : i32
    return %c0_i32, %c0_i32_0 : i32, i32
  }
  func.func @transform_4(%arg0: i32, %arg1: i32, %arg2: i32) -> (i32, i32) {
    %c0_i32 = arith.constant 0 : i32
    %c0_i32_0 = arith.constant 0 : i32
    %c0_i32_1 = arith.constant 0 : i32
    return %c0_i32, %c0_i32_0 : i32, i32
  }
  func.func @transform_5(%arg0: i32, %arg1: i32, %arg2: i32) -> (i32, i32) {
    %c0_i32 = arith.constant 0 : i32
    %c0_i32_0 = arith.constant 0 : i32
    %c0_i32_1 = arith.constant 0 : i32
    return %c0_i32, %c0_i32_0 : i32, i32
  }
  func.func @transform_6(%arg0: i32, %arg1: i32, %arg2: i32) -> (i32, i32) {
    %c0_i32 = arith.constant 0 : i32
    %c0_i32_0 = arith.constant 0 : i32
    %c0_i32_1 = arith.constant 0 : i32
    return %c0_i32, %c0_i32_0 : i32, i32
  }
  func.func @transform_7(%arg0: i32, %arg1: i32, %arg2: i32) -> (i32, i32) {
    %c0_i32 = arith.constant 0 : i32
    %c0_i32_0 = arith.constant 0 : i32
    %c0_i32_1 = arith.constant 0 : i32
    return %c0_i32, %c0_i32_0 : i32, i32
  }
  func.func @transform_8(%arg0: i32, %arg1: i32, %arg2: i32) -> (i32, i32) {
    %c0_i32 = arith.constant 0 : i32
    %c0_i32_0 = arith.constant 0 : i32
    %c0_i32_1 = arith.constant 0 : i32
    return %c0_i32, %c0_i32_0 : i32, i32
  }
  func.func @transform_9(%arg0: i32, %arg1: i32, %arg2: i32) -> (i32, i32) {
    %c0_i32 = arith.constant 0 : i32
    %c0_i32_0 = arith.constant 0 : i32
    %c0_i32_1 = arith.constant 0 : i32
    return %c0_i32, %c0_i32_0 : i32, i32
  }
  func.func @transform_10(%arg0: i32, %arg1: i32, %arg2: i32) -> (i32, i32) {
    %c0_i32 = arith.constant 0 : i32
    %c0_i32_0 = arith.constant 0 : i32
    %c0_i32_1 = arith.constant 0 : i32
    return %c0_i32, %c0_i32_0 : i32, i32
  }
  func.func @transform_11(%arg0: i32, %arg1: i32, %arg2: i32) -> (i32, i32, i32) {
    %c0_i32 = arith.constant 0 : i32
    %c0_i32_0 = arith.constant 0 : i32
    return %arg0, %arg1, %c0_i32 : i32, i32, i32
  }
}

</mosaic_0001>

<bundles_post_ra>
// kernel: point_pairwise_relation_net.1
= control target key start
LH: loop header
LB: loop body
LE: loop exit
PB: predicated region body
PF: predicated region fallthrough
CT: control target
= control target key end

     0   :  { %s2394_s17 = smov 0   ;;  %s2396_s18 = smov 0   ;;  %s2903_s0 = inlined_call_operand.vmem [shape: f32[2,16,8], index: 0, kind: input, shape index: {}, may-alias: {0,1}]   ;;  %s2904_s1 = inlined_call_operand.vmem [shape: f32[2,16,8], index: 1, kind: input, shape index: {}, may-alias: {0,1}]   ;;  %s2905_s2 = inlined_call_operand.vmem [shape: f32[8,64], index: 2, kind: input, shape index: {}]   ;;  %s2906_s3 = inlined_call_operand.vmem [shape: f32[8,64], index: 3, kind: input, shape index: {}]   ;;  %s2907_s4 = inlined_call_operand.vmem [shape: f32[1,64], index: 4, kind: input, shape index: {}]   ;;  %s2908_s5 = inlined_call_operand.vmem [shape: f32[64,64], index: 5, kind: input, shape index: {}]   ;;  %s2909_s6 = inlined_call_operand.vmem [shape: f32[1,64], index: 6, kind: input, shape index: {}]   ;;  %s2910_s7 = inlined_call_operand.vmem [shape: f32[64,16], index: 7, kind: input, shape index: {}]   ;;  %s2911_s8 = inlined_call_operand.vmem [shape: f32[1,16], index: 8, kind: input, shape index: {}]   ;;  %s2912_s9 = inlined_call_operand.vmem [shape: f32[16,2], index: 9, kind: input, shape index: {}]   ;;  %s2913_s10 = inlined_call_operand.vmem [shape: f32[1,2], index: 10, kind: input, shape index: {}]   ;;  %s2914_s11 = inlined_call_operand.vmem [shape: f32[2,16,2], index: 11, kind: output, shape index: {}]  }
   0x1   :  { %s2398_s19 = smov 0  }
   0x2 LB: > { %s40_s20 = sadd.s32 1, %s2323_s18  ;;  %p2006_p0 = scmp.ge.s32.totalorder %s2327_s19, 1  ;;  %s2327_s19 = sphi %s2398_s19, %s21_s19   ;;  %s2323_s18 = sphi %s2396_s18, %s2916_s18   ;;  %s2319_s17 = sphi %s2394_s17, %s2915_s17  }
   0x3   : > { %p42_p1 = scmp.ge.s32.totalorder %s40_s20, 2  ;;  %p382_p2 = scmp.lt.s32.totalorder %s2327_s19, 3 }
   0x5   : > { %s2918_s20 = smov (%p42_p1, %s40_s20), 0  ;;  %p383_p3 = pnand %p2006_p0, %p382_p2 }
   0x6   : > { %v482_v0 = vld [vmem:[%s2905_s2] sm:$0xff] (!%p383_p3)  ;;  %p440_p4 = scmp.lt.s32.totalorder (!%p383_p3), %s2319_s17, 1  ;;  %v899_v3 = vld [vmem:[%s2908_s5 + $0x8] sm:$0xff] (!%p383_p3)  ;;  %vm490_vm0 = vcmask (!%p383_p3), 64512   ;;  %v900_v9 = vld [vmem:[%s2908_s5 + $0x10] sm:$0xff] (!%p383_p3)  ;;  %v660_v20 = vlaneseq (!%p383_p3)  ;;  %vm477_vm1 = vcmask (!%p383_p3), 523264  }
   0x7   : > { %386 = sbr.rel (%p383_p3) target bundleno = 1407 (0x57f), region = 64  ;;  %v572_v1 = vld [vmem:[%s2906_s3] sm:$0xff] (!%p383_p3)  ;;  %2122 = vmatprep.subr.mxu0 (!%p383_p3), %v482_v0  ;;  %v901_v10 = vld [vmem:[%s2908_s5 + $0x18] sm:$0xff] (!%p383_p3)  ;;  %v903_v13 = vld [vmem:[%s2908_s5 + $0x28] sm:$0xff] (!%p383_p3)  ;;  %v2329_v18 = vmov (!%p383_p3), 1966171168  }
   0x8   : > { %v898_v2 = vld [vmem:[%s2908_s5] sm:$0xff] (!%p383_p3)  ;;  %2127 = vmatprep.subr.mxu1 (!%p383_p3), %v572_v1  ;;  %2123 = vmatpush3.msra.mxu0 (!%p383_p3), %v482_v0  ;;  %v2226_v11 = vpack.c.bf16 (!%p383_p3), %v901_v10, %v900_v9  ;;  %v904_v15 = vld [vmem:[%s2908_s5 + $0x30] sm:$0xff] (!%p383_p3)  ;;  %v905_v16 = vld [vmem:[%s2908_s5 + $0x38] sm:$0xff] (!%p383_p3)  ;;  %v658_v19 = vunpack.c.l.s4 (!%p383_p3), %v2329_v18  ;;  %v661_v22 = vshrl.u32 (!%p383_p3), %v660_v20, 7  ;;  %vm1429_vm2 = vcmask (!%p383_p3), 1041409   ;;  %s2331_s12 = smov (!%p383_p3), 1  }
   0x9   : > { %2128 = vmatpush3.msra.mxu1 (!%p383_p3), %v572_v1  ;;  %v2222_v4 = vpack.c.bf16 (!%p383_p3), %v899_v3, %v898_v2  ;;  %v902_v12 = vld [vmem:[%s2908_s5 + $0x20] sm:$0xff] (!%p383_p3)  ;;  %v2234_v17 = vpack.c.bf16 (!%p383_p3), %v905_v16, %v904_v15  ;;  %vm1431_vm3 = vcmask (!%p383_p3), 1042434   ;;  %vm1433_vm4 = vcmask (!%p383_p3), 1043459  }
   0xa   : > { %v2230_v14 = vpack.c.bf16 (!%p383_p3), %v903_v13, %v902_v12  ;;  %v659_v21 = vunpack.c.0.s8 (!%p383_p3), %v658_v19  ;;  %v2013_v23 = vld [vmem:[%s2907_s4] ss:$0 sm:$0xff] (!%p383_p3)  ;;  %v2460_v38 = vsub.s32 (!%p383_p3), 0, %v661_v22  ;;  %vm1435_vm5 = vcmask (!%p383_p3), 1044484  }
   0xb   : > { %2223 = vmatprep.subr.bf16.mxu0 (!%p383_p3), %v2222_v4  ;;  %2258 = vmatprep.subr.bf16.mxu1 (!%p383_p3), %v2222_v4  ;;  %vm1437_vm6 = vcmask (!%p383_p3), 1045509   ;;  %vm1439_vm7 = vcmask (!%p383_p3), 1046534   ;;  %vm1441_vm8 = vcmask (!%p383_p3), 1047559   ;;  %vm1759_vm10 = vcmask (!%p383_p3), 130048  }
   0xc   : > { %v662_v24 = vsub.s32 (!%p383_p3), %v659_v21, %v661_v22  ;;  %vm1891_vm11 = vcmask (!%p383_p3), 15360  }
   0xe   : > { %s2920_s17 = smov (!%p440_p4, %s2319_s17), 1 }
   0xf   : > { %s2424_s29 = sshll.u32 %s2920_s17, 4 }
  0x10   : > { %s447_s13 = scalar_lea.vmem %s2903_s0, %s2424_s29  ;;  %s457_s16 = scalar_lea.vmem %s2904_s1, %s2424_s29 }
  0x11   : > { %v469_v5 = vld [vmem:[%s447_s13] sm:$0xff]  ;;  %v470_v6 = vld [vmem:[%s447_s13 + $0x8] sm:$0xff]  ;;  %s2333_s13 = smov 127  }
  0x12   : > { %2124 = vmatprep.mubr.msk.f32.mxu0 %vm490_vm0, %v469_v5  ;;  %v471_v7 = vld [vmem:[%s457_s16] sm:$0xff]  ;;  %v472_v8 = vld [vmem:[%s457_s16 + $0x8] sm:$0xff]  ;;  %s467_s16 = scalar_lea.vmem %s2914_s11, %s2424_s29 }
  0x13   : > { %2125 = vmatmul.mubr.msk.f32.vlgmr.msra.gmra.mrb[0].mxu0 %vm490_vm0, %v470_v6  ;;  %2129 = vmatprep.mubr.msk.f32.mxu1 %vm490_vm0, %v471_v7 }
  0x14   : > { %2130 = vmatmul.mubr.msk.f32.vlgmr.msra.gmra.mrb[0].mxu1 %vm490_vm0, %v472_v8  ;;  %2225 = vmatpush3.bf16.msra.mxu0 %v2222_v4 }
  0x15   : > { %2262 = vmatpush3.bf16.msra.mxu1 %v2222_v4  ;;  %2227 = vmatprep.subr.bf16.mxu0 %v2226_v11 }
  0x16   : > { %2259 = vmatprep.subr.bf16.mxu1 %v2226_v11 }
  0x18   : > { %2229 = vmatpush3.bf16.msra.mxu0 %v2226_v11 }
  0x19   : > { %2263 = vmatpush3.bf16.msra.mxu1 %v2226_v11  ;;  %2231 = vmatprep.subr.bf16.mxu0 %v2230_v14 }
  0x1a   : > { %2260 = vmatprep.subr.bf16.mxu1 %v2230_v14 }
  0x1c   : > { %2233 = vmatpush3.bf16.msra.mxu0 %v2230_v14 }
  0x1d   : > { %2264 = vmatpush3.bf16.msra.mxu1 %v2230_v14  ;;  %2235 = vmatprep.subr.bf16.mxu0 %v2234_v17 }
  0x1e   : > { %2261 = vmatprep.subr.bf16.mxu1 %v2234_v17 }
  0x20   : > { %2237 = vmatpush3.bf16.msra.mxu0 %v2234_v17 }
  0x21   : > { %2265 = vmatpush3.bf16.msra.mxu1 %v2234_v17 }
  0xe6   : > { %v2126_v25 = vpop.f32.mrb[0].mxu0 }
  0xe7   : > { %v569_v26 = vadd.f32 %v2126_v25, %v2013_v23  ;;  %v563_v27 = vpop.f32.mrb[1].mxu0  ;;  %v2456_v28 = vpop.f32.mrb[0].mxu1 }
  0xe8   : > { %v564_v29 = vadd.f32 %v2013_v23, %v563_v27  ;;  %v2458_v30 = vpop.f32.mrb[1].mxu1 }
  0xe9   : > { %v705_v31 = vcombine.high %v569_v26, %v569_v26  ;;  %v712_v32 = vrot.slane %v569_v26, %v662_v24 }
  0xea   : > { %v656_v33 = vcombine.high %v564_v29, %v564_v29  ;;  %v663_v34 = vrot.slane %v564_v29, %v662_v24 }
  0xeb   : > { %v719_v35 = vrot.slane %v705_v31, %v662_v24  ;;  %v720_v36 = vcombine.high %v712_v32, %v712_v32  ;;  %v728_v37 = vrot.slane %v712_v32, %v662_v24 }
  0xec   : > { %v670_v39 = vrot.slane %v656_v33, %v662_v24  ;;  %v671_v40 = vcombine.high %v663_v34, %v663_v34  ;;  %v679_v41 = vrot.slane %v663_v34, %v662_v24 }
  0xed   : > { %v721_v42 = vcombine.high %v719_v35, %v719_v35  ;;  %v2462_v43 = vrot.slane %v719_v35, %v662_v24  ;;  %v742_v44 = vrot.slane %v720_v36, %v662_v24  ;;  %v750_v45 = vcombine.high %v728_v37, %v728_v37 }
  0xee   : > { %v2464_v46 = vrot.slane %v670_v39, %v662_v24  ;;  %v693_v47 = vrot.slane %v671_v40, %v662_v24  ;;  %v2468_v49 = vrot.slane %v728_v37, %v2460_v38  ;;  %v672_v51 = vcombine.high %v670_v39, %v670_v39 }
  0xef   : > { %v793_v48 = vrot.slane %v742_v44, %v2460_v38  ;;  %v797_v50 = vrot.slane %v750_v45, %v2460_v38  ;;  %v701_v52 = vcombine.high %v679_v41, %v679_v41  ;;  %v2471_v53 = vrot.slane %v721_v42, %v662_v24 }
  0xf0   : > { %v752_v54 = vcombine.high %v742_v44, %v742_v44  ;;  %v805_v55 = vrot.slane %v2462_v43, %v2460_v38  ;;  %v757_v56 = vrot.slane %v679_v41, %v2460_v38  ;;  %v703_v57 = vcombine.high %v693_v47, %v693_v47 }
  0xf1   : > { %v761_v58 = vrot.slane %v693_v47, %v2460_v38  ;;  %v765_v59 = vrot.slane %v701_v52, %v2460_v38  ;;  %v773_v60 = vrot.slane %v2464_v46, %v2460_v38  ;;  %v852_v63 = vadd.f32 %v793_v48, %v2458_v30 }
  0xf2   : > { %v834_v61 = vadd.f32 %v757_v56, %v2458_v30  ;;  %v835_v62 = vadd.f32 %v2456_v28, %v757_v56  ;;  %v853_v0 = vadd.f32 %v2456_v28, %v793_v48  ;;  %v854_v2 = vadd.f32 %v797_v50, %v2458_v30 }
  0xf3   : > { %v836_v1 = vadd.f32 %v761_v58, %v2458_v30  ;;  %v837_v3 = vadd.f32 %v2456_v28, %v761_v58  ;;  %v838_v4 = vadd.f32 %v765_v59, %v2458_v30  ;;  %v884_v7 = vmax.f32 %v852_v63, 0.0 }
  0xf4   : > { %v866_v5 = vmax.f32 %v834_v61, 0.0  ;;  %v867_v6 = vmax.f32 %v835_v62, 0.0  ;;  %v885_v8 = vmax.f32 %v853_v0, 0.0  ;;  %v751_v9 = vcombine.high %v2462_v43, %v2462_v43 }
  0xf5   : > { %v753_v10 = vcombine.high %v2471_v53, %v2471_v53  ;;  %v700_v11 = vrot.slane %v672_v51, %v662_v24  ;;  %v868_v12 = vmax.f32 %v836_v1, 0.0  ;;  %2175 = vmatprep.mubr.msk.f32.mxu1 %vm477_vm1, %v884_v7  ;;  %v886_v13 = vmax.f32 %v854_v2, 0.0 }
  0xf6   : > { %2148 = vmatprep.mubr.msk.f32.mxu0 %vm477_vm1, %v866_v5  ;;  %v855_v14 = vadd.f32 %v2456_v28, %v797_v50  ;;  %v801_v15 = vrot.slane %v752_v54, %v2460_v38  ;;  %v839_v16 = vadd.f32 %v2456_v28, %v765_v59  ;;  %2176 = vmatmul.mubr.msk.f32.vlgmr.msra.gmra.mrb[2].mxu1 %vm477_vm1, %v885_v8  ;;  %v869_v24 = vmax.f32 %v837_v3, 0.0 }
  0xf7   : > { %2149 = vmatmul.mubr.msk.f32.vlgmr.msra.gmra.mrb[2].mxu0 %vm477_vm1, %v867_v6  ;;  %v769_v17 = vrot.slane %v703_v57, %v2460_v38  ;;  %v858_v18 = vadd.f32 %v805_v55, %v2458_v30  ;;  %v842_v19 = vadd.f32 %v773_v60, %v2458_v30  ;;  %v702_v21 = vcombine.high %v2464_v46, %v2464_v46 }
  0xf8   : > { %2151 = vmatprep.mubr.msk.f32.mxu0 %vm477_vm1, %v868_v12  ;;  %2178 = vmatprep.mubr.msk.f32.mxu1 %vm477_vm1, %v886_v13  ;;  %v856_v22 = vadd.f32 %v801_v15, %v2458_v30  ;;  %v857_v23 = vadd.f32 %v2456_v28, %v801_v15  ;;  %v887_v25 = vmax.f32 %v855_v14, 0.0  ;;  %v870_v29 = vmax.f32 %v838_v4, 0.0  ;;  %v1652_v12 = vld [vmem:[%s2910_s7] sm:$0xff]  ;;  %v1653_v13 = vld [vmem:[%s2910_s7 + $0x8] sm:$0xff]  ;;  %v1654_v15 = vld [vmem:[%s2910_s7 + $0x10] sm:$0xff] }
  0xf9   : > { %v840_v26 = vadd.f32 %v769_v17, %v2458_v30  ;;  %v841_v27 = vadd.f32 %v2456_v28, %v769_v17  ;;  %v859_v32 = vadd.f32 %v2456_v28, %v805_v55  ;;  %v809_v33 = vrot.slane %v2471_v53, %v2460_v38 }
  0xfa   : > { %v888_v31 = vmax.f32 %v856_v22, 0.0  ;;  %v704_v34 = vcombine.high %v700_v11, %v700_v11  ;;  %2179 = vmatmul.mubr.msk.f32.gmra.mrb[4].mxu1 %vm477_vm1, %v887_v25  ;;  %v843_v35 = vadd.f32 %v2456_v28, %v773_v60  ;;  %v777_v36 = vrot.slane %v700_v11, %v2460_v38  ;;  %v1658_v22 = vld [vmem:[%s2910_s7 + $0x30] sm:$0xff]  ;;  %v2592_v25 = vld [vmem:[%s2909_s6] ss:$0 sm:$0xff] }
  0xfb   : > { %2152 = vmatmul.mubr.msk.f32.gmra.mrb[4].mxu0 %vm477_vm1, %v869_v24  ;;  %v871_v37 = vmax.f32 %v839_v16, 0.0  ;;  %v860_v39 = vadd.f32 %v809_v33, %v2458_v30  ;;  %v861_v40 = vadd.f32 %v2456_v28, %v809_v33  ;;  %v813_v41 = vrot.slane %v751_v9, %v2460_v38  ;;  %v1655_v16 = vld [vmem:[%s2910_s7 + $0x18] sm:$0xff] }
  0xfc   : > { %2154 = vmatprep.mubr.msk.f32.mxu0 %vm477_vm1, %v870_v29  ;;  %2181 = vmatprep.mubr.msk.f32.mxu1 %vm477_vm1, %v888_v31  ;;  %v889_v42 = vmax.f32 %v857_v23, 0.0  ;;  %v844_v43 = vadd.f32 %v777_v36, %v2458_v30  ;;  %v845_v44 = vadd.f32 %v2456_v28, %v777_v36  ;;  %v781_v45 = vrot.slane %v702_v21, %v2460_v38  ;;  %v1659_v23 = vld [vmem:[%s2910_s7 + $0x38] sm:$0xff] }
  0xfd   : > { %v872_v46 = vmax.f32 %v840_v26, 0.0  ;;  %v890_v47 = vmax.f32 %v858_v18, 0.0  ;;  %v862_v48 = vadd.f32 %v813_v41, %v2458_v30  ;;  %v863_v50 = vadd.f32 %v2456_v28, %v813_v41  ;;  %v1656_v18 = vld [vmem:[%s2910_s7 + $0x20] sm:$0xff] }
  0xfe   : > { %2182 = vmatmul.mubr.msk.f32.gmra.mrb[6].mxu1 %vm477_vm1, %v889_v42  ;;  %v846_v51 = vadd.f32 %v781_v45, %v2458_v30  ;;  %v817_v52 = vrot.slane %v753_v10, %v2460_v38  ;;  %v873_v53 = vmax.f32 %v841_v27, 0.0  ;;  %v874_v54 = vmax.f32 %v842_v19, 0.0  ;;  %v1657_v19 = vld [vmem:[%s2910_s7 + $0x28] sm:$0xff] }
  0xff   : > { %2155 = vmatmul.mubr.msk.f32.gmra.mrb[6].mxu0 %vm477_vm1, %v871_v37  ;;  %2184 = vmatprep.mubr.msk.f32.mxu1 %vm477_vm1, %v890_v47  ;;  %v847_v55 = vadd.f32 %v2456_v28, %v781_v45  ;;  %v785_v56 = vrot.slane %v704_v34, %v2460_v38  ;;  %v891_v57 = vmax.f32 %v859_v32, 0.0  ;;  %v850_v60 = vadd.f32 %v2468_v49, %v2458_v30 }
 0x100   : > { %2157 = vmatprep.mubr.msk.f32.mxu0 %vm477_vm1, %v872_v46  ;;  %v864_v58 = vadd.f32 %v817_v52, %v2458_v30  ;;  %v865_v59 = vadd.f32 %v2456_v28, %v817_v52  ;;  %v892_v61 = vmax.f32 %v860_v39, 0.0  ;;  %v851_v0 = vadd.f32 %v2456_v28, %v2468_v49 }
 0x101   : > { %v848_v62 = vadd.f32 %v785_v56, %v2458_v30  ;;  %v849_v63 = vadd.f32 %v2456_v28, %v785_v56  ;;  %v875_v38 = vmax.f32 %v843_v35, 0.0  ;;  %v893_v1 = vmax.f32 %v861_v40, 0.0 }
 0x102   : > { %2185 = vmatmul.mubr.msk.f32.gmra.mrb[8].mxu1 %vm477_vm1, %v891_v57  ;;  %v876_v2 = vmax.f32 %v844_v43, 0.0  ;;  %v894_v3 = vmax.f32 %v862_v48, 0.0  ;;  %v877_v28 = vmax.f32 %v845_v44, 0.0  ;;  %v895_v30 = vmax.f32 %v863_v50, 0.0 }
 0x103   : > { %2158 = vmatmul.mubr.msk.f32.gmra.mrb[8].mxu0 %vm477_vm1, %v873_v53  ;;  %2187 = vmatprep.mubr.msk.f32.mxu1 %vm477_vm1, %v892_v61  ;;  %v878_v49 = vmax.f32 %v846_v51, 0.0  ;;  %v896_v4 = vmax.f32 %v864_v58, 0.0  ;;  %v879_v5 = vmax.f32 %v847_v55, 0.0  ;;  %v897_v6 = vmax.f32 %v865_v59, 0.0 }
 0x104   : > { %2160 = vmatprep.mubr.msk.f32.mxu0 %vm477_vm1, %v874_v54  ;;  %v880_v7 = vmax.f32 %v848_v62, 0.0  ;;  %v881_v8 = vmax.f32 %v849_v63, 0.0  ;;  %v882_v9 = vmax.f32 %v850_v60, 0.0  ;;  %v883_v10 = vmax.f32 %v851_v0, 0.0 }
 0x105   : > { %v2330_v11 = vmov 0.0   ;;  %v2238_v14 = vpack.c.bf16 %v1653_v13, %v1652_v12  ;;  %v2242_v17 = vpack.c.bf16 %v1655_v16, %v1654_v15  ;;  %v2246_v21 = vpack.c.bf16 %v1657_v19, %v1656_v18 }
 0x106   : > { %2188 = vmatmul.mubr.msk.f32.gmra.mrb[10].mxu1 %vm477_vm1, %v893_v1  ;;  %478 = vst.msk [vmem:[#allocation2] sm:$0xff] %vm477_vm1, %v2330_v11  ;;  %479 = vst.msk [vmem:[#allocation2 + $0x8] sm:$0xff] %vm477_vm1, %v2330_v11  ;;  %v2250_v24 = vpack.c.bf16 %v1659_v23, %v1658_v22 }
 0x107   : > { %2161 = vmatmul.mubr.msk.f32.gmra.mrb[10].mxu0 %vm477_vm1, %v875_v38  ;;  %2190 = vmatprep.mubr.msk.f32.mxu1 %vm477_vm1, %v894_v3  ;;  %480 = vst.msk [vmem:[#allocation3] sm:$0xff] %vm477_vm1, %v2330_v11  ;;  %481 = vst.msk [vmem:[#allocation3 + $0x8] sm:$0xff] %vm477_vm1, %v2330_v11 }
 0x108   : > { %2163 = vmatprep.mubr.msk.f32.mxu0 %vm477_vm1, %v876_v2  ;;  %2239 = vmatprep.subr.bf16.mxu1 %v2238_v14 }
 0x109   : > { %2241 = vmatpush3.bf16.msra.mxu1 %v2238_v14 }
 0x10a   : > { %2191 = vmatmul.mubr.msk.f32.gmra.mrb[12].mxu1 %vm477_vm1, %v895_v30  ;;  %2243 = vmatprep.subr.bf16.mxu1 %v2242_v17 }
 0x10b   : > { %2164 = vmatmul.mubr.msk.f32.gmra.mrb[12].mxu0 %vm477_vm1, %v877_v28  ;;  %2193 = vmatprep.mubr.msk.f32.mxu1 %vm477_vm1, %v896_v4 }
 0x10c   : > { %2166 = vmatprep.mubr.msk.f32.mxu0 %vm477_vm1, %v878_v49 }
 0x10d   : > { %2245 = vmatpush3.bf16.msra.mxu1 %v2242_v17 }
 0x10e   : > { %2194 = vmatmul.mubr.msk.f32.gmra.mrb[14].mxu1 %vm477_vm1, %v897_v6  ;;  %2247 = vmatprep.subr.bf16.mxu1 %v2246_v21 }
 0x10f   : > { %2167 = vmatmul.mubr.msk.f32.gmra.mrb[14].mxu0 %vm477_vm1, %v879_v5 }
 0x110   : > { %2169 = vmatprep.mubr.msk.f32.mxu0 %vm477_vm1, %v880_v7 }
 0x111   : > { %2249 = vmatpush3.bf16.msra.mxu1 %v2246_v21 }
 0x112   : > { %2251 = vmatprep.subr.bf16.mxu1 %v2250_v24 }
 0x113   : > { %2170 = vmatmul.mubr.msk.f32.gmra.mrb[16].mxu0 %vm477_vm1, %v881_v8 }
 0x114   : > { %2172 = vmatprep.mubr.msk.f32.mxu0 %vm477_vm1, %v882_v9 }
 0x115   : > { %2253 = vmatpush3.bf16.msra.mxu1 %v2250_v24 }
 0x117   : > { %2173 = vmatmul.mubr.msk.f32.gmra.mrb[18].mxu0 %vm477_vm1, %v883_v10 }
 0x1c9   : > { %v2177_v27 = vpop.f32.mrb[2].mxu1 }
 0x1ca   : > { %v2150_v26 = vpop.f32.mrb[2].mxu0  ;;  %v1172_v32 = vadd.f32 %v2177_v27, %v2592_v25  ;;  %v1166_v33 = vpop.f32.mrb[3].mxu1 }
 0x1cb   : > { %v1082_v29 = vadd.f32 %v2150_v26, %v2592_v25  ;;  %v1076_v31 = vpop.f32.mrb[3].mxu0  ;;  %v1167_v35 = vadd.f32 %v2592_v25, %v1166_v33 }
 0x1cc   : > { %v1077_v34 = vadd.f32 %v2592_v25, %v1076_v31  ;;  %v1254_v37 = vmax.f32 %v1172_v32, 0.0 }
 0x1cd   : > { %v1236_v36 = vmax.f32 %v1082_v29, 0.0  ;;  %v1253_v40 = vmax.f32 %v1167_v35, 0.0  ;;  %v2180_v42 = vpop.f32.mrb[4].mxu1 }
 0x1ce   : > { %v1235_v39 = vmax.f32 %v1077_v34, 0.0  ;;  %v2153_v41 = vpop.f32.mrb[4].mxu0  ;;  %v1351_v45 = vsel %vm477_vm1, %v1254_v37, -inf  ;;  %v1540_v46 = vsel %vm477_vm1, %v1254_v37, 0.0  ;;  %v1176_v48 = vpop.f32.mrb[5].mxu1  ;;  %v1182_v60 = vadd.f32 %v2180_v42, %v2592_v25 }
 0x1cf   : > { %v1270_v43 = vsel %vm477_vm1, %v1236_v36, -inf  ;;  %v1459_v44 = vsel %vm477_vm1, %v1236_v36, 0.0  ;;  %v1086_v47 = vpop.f32.mrb[5].mxu0  ;;  %v1350_v52 = vsel %vm477_vm1, %v1253_v40, -inf  ;;  %v1539_v53 = vsel %vm477_vm1, %v1253_v40, 0.0 }
 0x1d0   : > { %v1269_v50 = vsel %vm477_vm1, %v1235_v39, -inf  ;;  %v1458_v51 = vsel %vm477_vm1, %v1235_v39, 0.0  ;;  %v2606_v56 = vmax.f32 %v1350_v52, %v1351_v45  ;;  %v2608_v57 = vadd.f32 %v1540_v46, %v1539_v53 }
 0x1d1   : > { %v1271_v54 = vmax.f32 %v1269_v50, %v1270_v43  ;;  %v1460_v55 = vadd.f32 %v1459_v44, %v1458_v51  ;;  %v1092_v58 = vadd.f32 %v2153_v41, %v2592_v25  ;;  %v1087_v59 = vadd.f32 %v2592_v25, %v1086_v47  ;;  %v2183_v63 = vpop.f32.mrb[6].mxu1 }
 0x1d2   : > { %v1177_v61 = vadd.f32 %v2592_v25, %v1176_v48  ;;  %v2156_v62 = vpop.f32.mrb[6].mxu0  ;;  %v1186_v2 = vpop.f32.mrb[7].mxu1  ;;  %v1256_v4 = vmax.f32 %v1182_v60, 0.0  ;;  %v1192_v45 = vadd.f32 %v2183_v63, %v2592_v25 }
 0x1d3   : > { %v1272_v0 = vrot.slane %v1271_v54, 4  ;;  %v1461_v38 = vrot.slane %v1460_v55, 4  ;;  %v1096_v1 = vpop.f32.mrb[7].mxu0  ;;  %v1238_v3 = vmax.f32 %v1092_v58, 0.0  ;;  %v1237_v28 = vmax.f32 %v1087_v59, 0.0 }
 0x1d4   : > { %v1255_v5 = vmax.f32 %v1177_v61, 0.0  ;;  %v1360_v18 = vsel %vm477_vm1, %v1256_v4, -inf  ;;  %v1549_v19 = vsel %vm477_vm1, %v1256_v4, 0.0  ;;  %v1102_v43 = vadd.f32 %v2156_v62, %v2592_v25 }
 0x1d5   : > { %v1273_v30 = vmax.f32 %v1271_v54, %v1272_v0  ;;  %v1462_v49 = vadd.f32 %v1461_v38, %v1460_v55  ;;  %v1279_v6 = vsel %vm477_vm1, %v1238_v3, -inf  ;;  %v1468_v7 = vsel %vm477_vm1, %v1238_v3, 0.0  ;;  %v2620_v11 = vpop.f32.mrb[8].mxu1 }
 0x1d6   : > { %v1278_v8 = vsel %vm477_vm1, %v1237_v28, -inf  ;;  %v1467_v9 = vsel %vm477_vm1, %v1237_v28, 0.0  ;;  %v2618_v10 = vpop.f32.mrb[8].mxu0  ;;  %v2624_v15 = vpop.f32.mrb[9].mxu1  ;;  %v1359_v23 = vsel %vm477_vm1, %v1255_v5, -inf  ;;  %v1548_v24 = vsel %vm477_vm1, %v1255_v5, 0.0 }
 0x1d7   : > { %v1274_v12 = vrot.slane %v1273_v30, 2  ;;  %v1463_v13 = vrot.slane %v1462_v49, 2  ;;  %v2622_v14 = vpop.f32.mrb[9].mxu0  ;;  %v1280_v16 = vmax.f32 %v1278_v8, %v1279_v6  ;;  %v1469_v17 = vadd.f32 %v1468_v7, %v1467_v9 }
 0x1d8   : > { %v2638_v36 = vmax.f32 %v1359_v23, %v1360_v18  ;;  %v2640_v37 = vadd.f32 %v1549_v19, %v1548_v24  ;;  %v1097_v44 = vadd.f32 %v2592_v25, %v1096_v1  ;;  %v1187_v46 = vadd.f32 %v2592_v25, %v1186_v2 }
 0x1d9   : > { %v1281_v21 = vrot.slane %v1280_v16, 4  ;;  %v1470_v22 = vrot.slane %v1469_v17, 4  ;;  %v2632_v27 = vpop.f32.mrb[10].mxu1  ;;  %v1275_v29 = vmax.f32 %v1273_v30, %v1274_v12  ;;  %v1464_v31 = vadd.f32 %v1463_v13, %v1462_v49 }
 0x1da   : > { %v2630_v26 = vpop.f32.mrb[10].mxu0  ;;  %v2636_v33 = vpop.f32.mrb[11].mxu1  ;;  %v1240_v54 = vmax.f32 %v1102_v43, 0.0  ;;  %v1239_v55 = vmax.f32 %v1097_v44, 0.0  ;;  %v1258_v58 = vmax.f32 %v1192_v45, 0.0  ;;  %v1257_v61 = vmax.f32 %v1187_v46, 0.0 }
 0x1db   : > { %v2634_v32 = vpop.f32.mrb[11].mxu0  ;;  %v1282_v34 = vmax.f32 %v1280_v16, %v1281_v21  ;;  %v1471_v35 = vadd.f32 %v1470_v22, %v1469_v17  ;;  %v1276_v50 = vrot.slane %v1275_v29, 1  ;;  %v1465_v51 = vrot.slane %v1464_v31, 1 }
 0x1dc   : > { %v1288_v0 = vsel %vm477_vm1, %v1240_v54, -inf  ;;  %v1477_v38 = vsel %vm477_vm1, %v1240_v54, 0.0  ;;  %v1287_v1 = vsel %vm477_vm1, %v1239_v55, -inf  ;;  %v1476_v2 = vsel %vm477_vm1, %v1239_v55, 0.0 }
 0x1dd   : > { %v1283_v39 = vrot.slane %v1282_v34, 2  ;;  %v1472_v40 = vrot.slane %v1471_v35, 2  ;;  %v2644_v42 = vpop.f32.mrb[12].mxu1  ;;  %v1277_v30 = vmax.f32 %v1275_v29, %v1276_v50  ;;  %v1466_v49 = vadd.f32 %v1465_v51, %v1464_v31 }
 0x1de   : > { %v2642_v41 = vpop.f32.mrb[12].mxu0  ;;  %v2652_v48 = vpop.f32.mrb[13].mxu1  ;;  %v1289_v6 = vmax.f32 %v1287_v1, %v1288_v0  ;;  %v1478_v7 = vadd.f32 %v1477_v38, %v1476_v2  ;;  %v1369_v8 = vsel %vm477_vm1, %v1258_v58, -inf  ;;  %v1558_v9 = vsel %vm477_vm1, %v1258_v58, 0.0 }
 0x1df   : > { %v2650_v47 = vpop.f32.mrb[13].mxu0  ;;  %v1284_v52 = vmax.f32 %v1282_v34, %v1283_v39  ;;  %v1473_v53 = vadd.f32 %v1472_v40, %v1471_v35  ;;  %v1368_v19 = vsel %vm477_vm1, %v1257_v61, -inf  ;;  %v1557_v21 = vsel %vm477_vm1, %v1257_v61, 0.0 }
 0x1e0   : > { %v1290_v17 = vrot.slane %v1289_v6, 4  ;;  %v1479_v18 = vrot.slane %v1478_v7, 4  ;;  %v2676_v23 = vmax.f32 %v1368_v19, %v1369_v8  ;;  %v2678_v24 = vadd.f32 %v1558_v9, %v1557_v21 }
 0x1e1   : > { %v1285_v59 = vrot.slane %v1284_v52, 1  ;;  %v1474_v60 = vrot.slane %v1473_v53, 1  ;;  %v2656_v63 = vpop.f32.mrb[14].mxu1  ;;  %v1112_v34 = vadd.f32 %v2618_v10, %v2592_v25  ;;  %v1107_v35 = vadd.f32 %v2592_v25, %v2622_v14 }
 0x1e2   : > { %v2654_v62 = vpop.f32.mrb[14].mxu0  ;;  %v2664_v28 = vpop.f32.mrb[15].mxu1  ;;  %v1291_v29 = vmax.f32 %v1289_v6, %v1290_v17  ;;  %v1480_v31 = vadd.f32 %v1479_v18, %v1478_v7  ;;  %v1202_v39 = vadd.f32 %v2620_v11, %v2592_v25  ;;  %v1197_v40 = vadd.f32 %v2592_v25, %v2624_v15 }
 0x1e3   : > { %v2662_v3 = vpop.f32.mrb[15].mxu0  ;;  %v1286_v4 = vmax.f32 %v1284_v52, %v1285_v59  ;;  %v1475_v5 = vadd.f32 %v1474_v60, %v1473_v53  ;;  %v1242_v46 = vmax.f32 %v1112_v34, 0.0  ;;  %v1241_v50 = vmax.f32 %v1107_v35, 0.0 }
 0x1e4   : > { %v1292_v44 = vrot.slane %v1291_v29, 2  ;;  %v1481_v45 = vrot.slane %v1480_v31, 2  ;;  %v1353_v52 = vrot.slane %v2606_v56, 4  ;;  %v1260_v10 = vmax.f32 %v1202_v39, 0.0 }
 0x1e5   : > { %v1430_v12 = vsel %vm1429_vm2, %v1286_v4, %v1277_v30  ;;  %v1618_v13 = vsel %vm1429_vm2, %v1475_v5, %v1466_v49  ;;  %v1297_v14 = vsel %vm477_vm1, %v1242_v46, -inf  ;;  %v1486_v11 = vsel %vm477_vm1, %v1242_v46, 0.0 }
 0x1e6   : > { %v2670_v16 = vpop.f32.mrb[16].mxu0  ;;  %v1293_v53 = vmax.f32 %v1291_v29, %v1292_v44  ;;  %v1482_v54 = vadd.f32 %v1481_v45, %v1480_v31  ;;  %v1296_v15 = vsel %vm477_vm1, %v1241_v50, -inf  ;;  %v1485_v55 = vsel %vm477_vm1, %v1241_v50, 0.0 }
 0x1e7   : > { %v2674_v22 = vpop.f32.mrb[17].mxu0  ;;  %v1259_v58 = vmax.f32 %v1197_v40, 0.0  ;;  %v1298_v61 = vmax.f32 %v1296_v15, %v1297_v14  ;;  %v1487_v0 = vadd.f32 %v1486_v11, %v1485_v55  ;;  %v1354_v38 = vmax.f32 %v2606_v56, %v1353_v52 }
 0x1e8   : > { %v1294_v59 = vrot.slane %v1293_v53, 1  ;;  %v1483_v60 = vrot.slane %v1482_v54, 1  ;;  %v1542_v1 = vrot.slane %v2608_v57, 4  ;;  %v1378_v2 = vsel %vm477_vm1, %v1260_v10, -inf }
 0x1e9   : > { %v1567_v30 = vsel %vm477_vm1, %v1260_v10, 0.0  ;;  %v1299_v5 = vrot.slane %v1298_v61, 4  ;;  %v1488_v6 = vrot.slane %v1487_v0, 4  ;;  %v1377_v7 = vsel %vm477_vm1, %v1259_v58, -inf }
 0x1ea   : > { %v2688_v43 = vpop.f32.mrb[18].mxu0  ;;  %v1295_v49 = vmax.f32 %v1293_v53, %v1294_v59  ;;  %v1484_v4 = vadd.f32 %v1483_v60, %v1482_v54  ;;  %v1566_v8 = vsel %vm477_vm1, %v1259_v58, 0.0  ;;  %v1355_v19 = vrot.slane %v1354_v38, 2 }
 0x1eb   : > { %v2690_v51 = vpop.f32.mrb[19].mxu0  ;;  %v1300_v18 = vmax.f32 %v1298_v61, %v1299_v5  ;;  %v1489_v56 = vadd.f32 %v1488_v6, %v1487_v0  ;;  %v1543_v21 = vadd.f32 %v1542_v1, %v2608_v57  ;;  %v2706_v29 = vmax.f32 %v1377_v7, %v1378_v2 }
 0x1ec   : > { %v1432_v9 = vsel %vm1431_vm3, %v1295_v49, %v1430_v12  ;;  %v1619_v17 = vsel %vm1431_vm3, %v1484_v4, %v1618_v13  ;;  %v2708_v31 = vadd.f32 %v1567_v30, %v1566_v8  ;;  %v1122_v39 = vadd.f32 %v2630_v26, %v2592_v25 }
 0x1ed   : > { %v1301_v34 = vrot.slane %v1300_v18, 2  ;;  %v1490_v35 = vrot.slane %v1489_v56, 2  ;;  %v1117_v40 = vadd.f32 %v2592_v25, %v2634_v32  ;;  %v1212_v12 = vadd.f32 %v2632_v27, %v2592_v25 }
 0x1ee   : > { %v1207_v13 = vadd.f32 %v2592_v25, %v2636_v33  ;;  %v1244_v45 = vmax.f32 %v1122_v39, 0.0  ;;  %v1356_v50 = vmax.f32 %v1354_v38, %v1355_v19  ;;  %v1544_v52 = vrot.slane %v1543_v21, 2 }
 0x1ef   : > { %v1302_v44 = vmax.f32 %v1300_v18, %v1301_v34  ;;  %v1491_v57 = vadd.f32 %v1490_v35, %v1489_v56  ;;  %v1243_v46 = vmax.f32 %v1117_v40, 0.0  ;;  %v1262_v10 = vmax.f32 %v1212_v12, 0.0 }
 0x1f0   : > { %v1306_v26 = vsel %vm477_vm1, %v1244_v45, -inf  ;;  %v1495_v14 = vsel %vm477_vm1, %v1244_v45, 0.0  ;;  %v1261_v11 = vmax.f32 %v1207_v13, 0.0  ;;  %v1357_v59 = vrot.slane %v1356_v50, 1 }
 0x1f1   : > { %v1303_v53 = vrot.slane %v1302_v44, 1  ;;  %v1492_v54 = vrot.slane %v1491_v57, 1  ;;  %v1305_v32 = vsel %vm477_vm1, %v1243_v46, -inf  ;;  %v1494_v27 = vsel %vm477_vm1, %v1243_v46, 0.0 }
 0x1f2   : > { %v1307_v55 = vmax.f32 %v1305_v32, %v1306_v26  ;;  %v1496_v58 = vadd.f32 %v1495_v14, %v1494_v27  ;;  %v2722_v60 = vadd.f32 %v1544_v52, %v1543_v21  ;;  %v1387_v61 = vsel %vm477_vm1, %v1262_v10, -inf }
 0x1f3   : > { %v1304_v33 = vmax.f32 %v1302_v44, %v1303_v53  ;;  %v1493_v15 = vadd.f32 %v1492_v54, %v1491_v57  ;;  %v1576_v0 = vsel %vm477_vm1, %v1262_v10, 0.0  ;;  %v1386_v49 = vsel %vm477_vm1, %v1261_v11, -inf }
 0x1f4   : > { %v1308_v2 = vrot.slane %v1307_v55, 4  ;;  %v1497_v30 = vrot.slane %v1496_v58, 4  ;;  %v1575_v4 = vsel %vm477_vm1, %v1261_v11, 0.0  ;;  %v2730_v7 = vmax.f32 %v1386_v49, %v1387_v61 }
 0x1f5   : > { %v1434_v38 = vsel %vm1433_vm4, %v1304_v33, %v1432_v9  ;;  %v1620_v1 = vsel %vm1433_vm4, %v1493_v15, %v1619_v17  ;;  %v2732_v8 = vadd.f32 %v1576_v0, %v1575_v4  ;;  %v1546_v18 = vrot.slane %v2722_v60, 1 }
 0x1f6   : > { %v1309_v5 = vmax.f32 %v1307_v55, %v1308_v2  ;;  %v1498_v6 = vadd.f32 %v1497_v30, %v1496_v58  ;;  %v1132_v9 = vadd.f32 %v2642_v41, %v2592_v25  ;;  %v1127_v17 = vadd.f32 %v2592_v25, %v2650_v47 }
 0x1f7   : > { %v2740_v56 = vand.u32 127, %v660_v20  ;;  %v2742_v19 = vmax.f32 %v1356_v50, %v1357_v59  ;;  %v1362_v21 = vrot.slane %v2638_v36, 4  ;;  %v1222_v12 = vadd.f32 %v2644_v42, %v2592_v25 }
 0x1f8   : > { %v1310_v34 = vrot.slane %v1309_v5, 2  ;;  %v1499_v35 = vrot.slane %v1498_v6, 2  ;;  %v1246_v39 = vmax.f32 %v1132_v9, 0.0  ;;  %v1245_v40 = vmax.f32 %v1127_v17, 0.0 }
 0x1f9   : > { %v1217_v41 = vadd.f32 %v2592_v25, %v2652_v48  ;;  %v1551_v13 = vrot.slane %v2640_v37, 4  ;;  %v1371_v47 = vrot.slane %v2676_v23, 4  ;;  %v1363_v52 = vmax.f32 %v2638_v36, %v1362_v21 }
 0x1fa   : > { %v1311_v20 = vmax.f32 %v1309_v5, %v1310_v34  ;;  %v1500_v44 = vadd.f32 %v1499_v35, %v1498_v6  ;;  %v1315_v57 = vsel %vm477_vm1, %v1246_v39, -inf  ;;  %v1504_v45 = vsel %vm477_vm1, %v1246_v39, 0.0 }
 0x1fb   : > { %v1314_v46 = vsel %vm477_vm1, %v1245_v40, -inf  ;;  %v1503_v50 = vsel %vm477_vm1, %v1245_v40, 0.0  ;;  %v1560_v42 = vrot.slane %v2678_v24, 4  ;;  %v1264_v26 = vmax.f32 %v1222_v12, 0.0 }
 0x1fc   : > { %v1312_v10 = vrot.slane %v1311_v20, 1  ;;  %v1501_v48 = vrot.slane %v1500_v44, 1  ;;  %v1316_v53 = vmax.f32 %v1314_v46, %v1315_v57  ;;  %v1505_v54 = vadd.f32 %v1504_v45, %v1503_v50 }
 0x1fd   : > { %v1263_v14 = vmax.f32 %v1217_v41, 0.0  ;;  %v1552_v32 = vadd.f32 %v1551_v13, %v2640_v37  ;;  %v1372_v27 = vmax.f32 %v2676_v23, %v1371_v47  ;;  %v1396_v58 = vsel %vm477_vm1, %v1264_v26, -inf }
 0x1fe   : > { %v1313_v11 = vmax.f32 %v1311_v20, %v1312_v10  ;;  %v1502_v33 = vadd.f32 %v1501_v48, %v1500_v44  ;;  %v1317_v15 = vrot.slane %v1316_v53, 4  ;;  %v1506_v55 = vrot.slane %v1505_v54, 4 }
 0x1ff   : > { %v1585_v36 = vsel %vm477_vm1, %v1264_v26, 0.0  ;;  %v1364_v59 = vrot.slane %v1363_v52, 2  ;;  %v1561_v61 = vadd.f32 %v1560_v42, %v2678_v24  ;;  %v1395_v23 = vsel %vm477_vm1, %v1263_v14, -inf }
 0x200   : > { %v1436_v0 = vsel %vm1435_vm5, %v1313_v11, %v1434_v38  ;;  %v1621_v2 = vsel %vm1435_vm5, %v1502_v33, %v1620_v1  ;;  %v1318_v30 = vmax.f32 %v1316_v53, %v1317_v15  ;;  %v1507_v37 = vadd.f32 %v1506_v55, %v1505_v54 }
 0x201   : > { %v1584_v49 = vsel %vm477_vm1, %v1263_v14, 0.0  ;;  %v1553_v4 = vrot.slane %v1552_v32, 2  ;;  %v1373_v5 = vrot.slane %v1372_v27, 2  ;;  %v2766_v6 = vmax.f32 %v1395_v23, %v1396_v58 }
 0x202   : > { %v2768_v9 = vadd.f32 %v1585_v36, %v1584_v49  ;;  %v1319_v17 = vrot.slane %v1318_v30, 2  ;;  %v1508_v21 = vrot.slane %v1507_v37, 2  ;;  %v1142_v24 = vadd.f32 %v2654_v62, %v2592_v25 }
 0x203   : > { %v1137_v38 = vadd.f32 %v2592_v25, %v2662_v3  ;;  %v2775_v1 = vadd.f32 %v1546_v18, %v2722_v60  ;;  %v1562_v34 = vrot.slane %v1561_v61, 2  ;;  %v1232_v35 = vadd.f32 %v2656_v63, %v2592_v25 }
 0x204   : > { %v1227_v39 = vadd.f32 %v2592_v25, %v2664_v28  ;;  %v1320_v40 = vmax.f32 %v1318_v30, %v1319_v17  ;;  %v1509_v12 = vadd.f32 %v1508_v21, %v1507_v37  ;;  %v1248_v41 = vmax.f32 %v1142_v24, 0.0 }
 0x205   : > { %v1247_v13 = vmax.f32 %v1137_v38, 0.0  ;;  %v2781_v47 = vmax.f32 %v1363_v52, %v1364_v59  ;;  %v2783_v62 = vadd.f32 %v1553_v4, %v1552_v32  ;;  %v2785_v20 = vmax.f32 %v1372_v27, %v1373_v5 }
 0x206   : > { %v1266_v3 = vmax.f32 %v1232_v35, 0.0  ;;  %v1321_v60 = vrot.slane %v1320_v40, 1  ;;  %v1510_v18 = vrot.slane %v1509_v12, 1  ;;  %v1324_v44 = vsel %vm477_vm1, %v1248_v41, -inf }
 0x207   : > { %v1513_v63 = vsel %vm477_vm1, %v1248_v41, 0.0  ;;  %v2789_v57 = vadd.f32 %v1562_v34, %v1561_v61  ;;  %v1323_v28 = vsel %vm477_vm1, %v1247_v13, -inf  ;;  %v1512_v45 = vsel %vm477_vm1, %v1247_v13, 0.0 }
 0x208   : > { %v1265_v46 = vmax.f32 %v1227_v39, 0.0  ;;  %v1322_v50 = vmax.f32 %v1320_v40, %v1321_v60  ;;  %v1511_v52 = vadd.f32 %v1510_v18, %v1509_v12  ;;  %v1325_v42 = vmax.f32 %v1323_v28, %v1324_v44 }
 0x209   : > { %v1514_v10 = vadd.f32 %v1513_v63, %v1512_v45  ;;  %v1380_v48 = vrot.slane %v2706_v29, 4  ;;  %v1569_v53 = vrot.slane %v2708_v31, 4  ;;  %v1405_v54 = vsel %vm477_vm1, %v1266_v3, -inf }
 0x20a   : > { %v1594_v26 = vsel %vm477_vm1, %v1266_v3, 0.0  ;;  %v1438_v14 = vsel %vm1437_vm6, %v1322_v50, %v1436_v0  ;;  %v1622_v32 = vsel %vm1437_vm6, %v1511_v52, %v1621_v2  ;;  %v1326_v27 = vrot.slane %v1325_v42, 4 }
 0x20b   : > { %v1515_v11 = vrot.slane %v1514_v10, 4  ;;  %v1366_v33 = vrot.slane %v2781_v47, 1  ;;  %v1555_v15 = vrot.slane %v2783_v62, 1  ;;  %v1404_v55 = vsel %vm477_vm1, %v1265_v46, -inf }
 0x20c   : > { %v1593_v58 = vsel %vm477_vm1, %v1265_v46, 0.0  ;;  %v1327_v36 = vmax.f32 %v1325_v42, %v1326_v27  ;;  %v1406_v61 = vmax.f32 %v1404_v55, %v1405_v54  ;;  %v1375_v37 = vrot.slane %v2785_v20, 1 }
 0x20d   : > { %v1516_v59 = vadd.f32 %v1515_v11, %v1514_v10  ;;  %v1595_v30 = vadd.f32 %v1594_v26, %v1593_v58  ;;  %v1564_v0 = vrot.slane %v2789_v57, 1  ;;  %v1152_v2 = vadd.f32 %v2670_v16, %v2592_v25 }
 0x20e   : > { %v1147_v23 = vadd.f32 %v2592_v25, %v2674_v22  ;;  %v2810_v49 = vmax.f32 %v2706_v29, %v1380_v48  ;;  %v2813_v4 = vadd.f32 %v1569_v53, %v2708_v31  ;;  %v1328_v5 = vrot.slane %v1327_v36, 2 }
 0x20f   : > { %v1517_v17 = vrot.slane %v1516_v59, 2  ;;  %v1250_v21 = vmax.f32 %v1152_v2, 0.0  ;;  %v1162_v38 = vadd.f32 %v2688_v43, %v2592_v25  ;;  %v1157_v34 = vadd.f32 %v2592_v25, %v2690_v51 }
 0x210   : > { %v1249_v24 = vmax.f32 %v1147_v23, 0.0  ;;  %v1389_v16 = vrot.slane %v2730_v7, 4  ;;  %v1578_v22 = vrot.slane %v2732_v8, 4  ;;  %v1329_v35 = vmax.f32 %v1327_v36, %v1328_v5 }
 0x211   : > { %v1518_v29 = vadd.f32 %v1517_v17, %v1516_v59  ;;  %v1333_v39 = vsel %vm477_vm1, %v1250_v21, -inf  ;;  %v1522_v31 = vsel %vm477_vm1, %v1250_v21, 0.0  ;;  %v1398_v41 = vrot.slane %v2766_v6, 4 }
 0x212   : > { %v1332_v40 = vsel %vm477_vm1, %v1249_v24, -inf  ;;  %v1521_v12 = vsel %vm477_vm1, %v1249_v24, 0.0  ;;  %v1587_v43 = vrot.slane %v2768_v9, 4  ;;  %v1330_v13 = vrot.slane %v1329_v35, 1 }
 0x213   : > { %v1519_v25 = vrot.slane %v1518_v29, 1  ;;  %v1334_v51 = vmax.f32 %v1332_v40, %v1333_v39  ;;  %v1523_v3 = vadd.f32 %v1522_v31, %v1521_v12  ;;  %v1252_v60 = vmax.f32 %v1162_v38, 0.0 }
 0x214   : > { %v1251_v18 = vmax.f32 %v1157_v34, 0.0  ;;  %v1331_v44 = vmax.f32 %v1329_v35, %v1330_v13  ;;  %v1407_v28 = vrot.slane %v1406_v61, 4  ;;  %v1596_v45 = vrot.slane %v1595_v30, 4 }
 0x215   : > { %v1520_v63 = vadd.f32 %v1519_v25, %v1518_v29  ;;  %v1335_v46 = vrot.slane %v1334_v51, 4  ;;  %v1524_v50 = vrot.slane %v1523_v3, 4  ;;  %v1342_v52 = vsel %vm477_vm1, %v1252_v60, -inf  ;;  %v1267_v25 = vld [vmem:[#allocation2] sm:$0xff] }
 0x216   : > { %v1531_v42 = vsel %vm477_vm1, %v1252_v60, 0.0  ;;  %v1390_v10 = vmax.f32 %v2730_v7, %v1389_v16  ;;  %v1579_v48 = vadd.f32 %v1578_v22, %v2732_v8  ;;  %v1440_v53 = vsel %vm1439_vm7, %v1331_v44, %v1438_v14 }
 0x217   : > { %v1623_v54 = vsel %vm1439_vm7, %v1520_v63, %v1622_v32  ;;  %v1336_v26 = vmax.f32 %v1334_v51, %v1335_v46  ;;  %v1525_v27 = vadd.f32 %v1524_v50, %v1523_v3  ;;  %v1341_v11 = vsel %vm477_vm1, %v1251_v18, -inf  ;;  %v1456_v3 = vld [vmem:[#allocation3] sm:$0xff] }
 0x218   : > { %v1530_v55 = vsel %vm477_vm1, %v1251_v18, 0.0  ;;  %v1399_v58 = vmax.f32 %v2766_v6, %v1398_v41  ;;  %v1588_v36 = vadd.f32 %v1587_v43, %v2768_v9  ;;  %v1343_v59 = vmax.f32 %v1341_v11, %v1342_v52 }
 0x219   : > { %v1532_v2 = vadd.f32 %v1531_v42, %v1530_v55  ;;  %v1408_v7 = vmax.f32 %v1406_v61, %v1407_v28  ;;  %v1597_v23 = vadd.f32 %v1596_v45, %v1595_v30  ;;  %v1337_v8 = vrot.slane %v1336_v26, 2 }
 0x21a   : > { %v1526_v5 = vrot.slane %v1525_v27, 2  ;;  %v1382_v14 = vrot.slane %v2810_v49, 2  ;;  %v1571_v32 = vrot.slane %v2813_v4, 2  ;;  %v1344_v17 = vrot.slane %v1343_v59, 4 }
 0x21b   : > { %v1533_v21 = vrot.slane %v1532_v2, 4  ;;  %v1391_v24 = vrot.slane %v1390_v10, 2  ;;  %v1580_v38 = vrot.slane %v1579_v48, 2  ;;  %v1338_v34 = vmax.f32 %v1336_v26, %v1337_v8 }
 0x21c   : > { %v1527_v16 = vadd.f32 %v1526_v5, %v1525_v27  ;;  %v1400_v22 = vrot.slane %v1399_v58, 2  ;;  %v1589_v6 = vrot.slane %v1588_v36, 2  ;;  %v1345_v35 = vmax.f32 %v1343_v59, %v1344_v17 }
 0x21d   : > { %v1534_v9 = vadd.f32 %v1533_v21, %v1532_v2  ;;  %v1409_v29 = vrot.slane %v1408_v7, 2  ;;  %v1598_v39 = vrot.slane %v1597_v23, 2  ;;  %v1339_v61 = vrot.slane %v1338_v34, 1 }
 0x21e   : > { %v1528_v30 = vrot.slane %v1527_v16, 1  ;;  %v1383_v31 = vmax.f32 %v2810_v49, %v1382_v14  ;;  %v1572_v40 = vadd.f32 %v1571_v32, %v2813_v4  ;;  %v1346_v12 = vrot.slane %v1345_v35, 2 }
 0x21f   : > { %v1535_v41 = vrot.slane %v1534_v9, 2  ;;  %v1392_v43 = vmax.f32 %v1390_v10, %v1391_v24  ;;  %v1581_v13 = vadd.f32 %v1580_v38, %v1579_v48  ;;  %v1340_v51 = vmax.f32 %v1338_v34, %v1339_v61  ;;  %v1268_v38 = vld [vmem:[#allocation2 + $0x8] sm:$0xff] }
 0x220   : > { %v1529_v60 = vadd.f32 %v1528_v30, %v1527_v16  ;;  %v1401_v18 = vmax.f32 %v1399_v58, %v1400_v22  ;;  %v1590_v44 = vadd.f32 %v1589_v6, %v1588_v36  ;;  %v1347_v63 = vmax.f32 %v1345_v35, %v1346_v12  ;;  %v1457_v16 = vld [vmem:[#allocation3 + $0x8] sm:$0xff] }
 0x221   : > { %v1536_v28 = vadd.f32 %v1535_v41, %v1534_v9  ;;  %v1410_v45 = vmax.f32 %v1408_v7, %v1409_v29  ;;  %v1599_v46 = vadd.f32 %v1598_v39, %v1597_v23  ;;  %v1442_v50 = vsel %vm1441_vm8, %v1340_v51, %v1440_v53  ;;  %v1751_v51 = vld [vmem:[%s2912_s9 + $0x8] sm:$0xff] }
 0x222   : > { %v1624_v49 = vsel %vm1441_vm8, %v1529_v60, %v1623_v54  ;;  %v1452_v52 = vmax.f32 %v1267_v25, %v1442_v50  ;;  %v1348_v42 = vrot.slane %v1347_v63, 1  ;;  %v1367_v10 = vmax.f32 %v2781_v47, %v1366_v33  ;;  %v2051_v60 = vld [vmem:[%s2911_s8] ss:$0 sm:$0xff] }
 0x223   : > { %v1634_v4 = vadd.f32 %v1624_v49, %v1456_v3  ;;  %v1537_v26 = vrot.slane %v1536_v28, 1  ;;  %v1556_v48 = vadd.f32 %v1555_v15, %v2783_v62  ;;  %v1384_v27 = vrot.slane %v1383_v31, 1  ;;  %v2054_v50 = vld [vmem:[%s2913_s10] ss:$0 sm:$0xff] }
 0x224   : > { %v1573_v11 = vrot.slane %v1572_v40, 1  ;;  %v1393_v55 = vrot.slane %v1392_v43, 1  ;;  %v1582_v58 = vrot.slane %v1581_v13, 1  ;;  %1454 = vst.msk [vmem:[#allocation2] sm:$0xff] %vm477_vm1, %v1452_v52  ;;  %v1349_v53 = vmax.f32 %v1347_v63, %v1348_v42 }
 0x225   : > { %1636 = vst.msk [vmem:[#allocation3] sm:$0xff] %vm477_vm1, %v1634_v4  ;;  %v1538_v54 = vadd.f32 %v1537_v26, %v1536_v28  ;;  %v1376_v36 = vmax.f32 %v2785_v20, %v1375_v37  ;;  %v1565_v47 = vadd.f32 %v1564_v0, %v2789_v57  ;;  %v1402_v33 = vrot.slane %v1401_v18, 1 }
 0x226   : > { %v1591_v62 = vrot.slane %v1590_v44, 1  ;;  %v1411_v15 = vrot.slane %v1410_v45, 1  ;;  %v1600_v59 = vrot.slane %v1599_v46, 1  ;;  %v1443_v2 = vsel %vm1429_vm2, %v2742_v19, %v1349_v53 }
 0x227   : > { %v1625_v7 = vsel %vm1429_vm2, %v2775_v1, %v1538_v54  ;;  %v1385_v23 = vmax.f32 %v1383_v31, %v1384_v27  ;;  %v1574_v8 = vadd.f32 %v1573_v11, %v1572_v40  ;;  %v1444_v5 = vsel %vm1431_vm3, %v1367_v10, %v1443_v2 }
 0x228   : > { %v1626_v20 = vsel %vm1431_vm3, %v1556_v48, %v1625_v7  ;;  %v1394_v37 = vmax.f32 %v1392_v43, %v1393_v55  ;;  %v1583_v14 = vadd.f32 %v1582_v58, %v1581_v13  ;;  %v1445_v57 = vsel %vm1433_vm4, %v1376_v36, %v1444_v5 }
 0x229   : > { %v1627_v0 = vsel %vm1433_vm4, %v1565_v47, %v1626_v20  ;;  %v1403_v32 = vmax.f32 %v1401_v18, %v1402_v33  ;;  %v1592_v17 = vadd.f32 %v1591_v62, %v1590_v44  ;;  %v1446_v21 = vsel %vm1435_vm5, %v1385_v23, %v1445_v57 }
 0x22a   : > { %v1628_v19 = vsel %vm1435_vm5, %v1574_v8, %v1627_v0  ;;  %v1412_v24 = vmax.f32 %v1410_v45, %v1411_v15  ;;  %v1601_v1 = vadd.f32 %v1600_v59, %v1599_v46  ;;  %v1447_v34 = vsel %vm1437_vm6, %v1394_v37, %v1446_v21 }
 0x22b   : > { %v1629_v22 = vsel %vm1437_vm6, %v1583_v14, %v1628_v19  ;;  %v1448_v6 = vsel %vm1439_vm7, %v1403_v32, %v1447_v34  ;;  %vm1649_vm9 = vcmp.lt.s32.totalorder %v2740_v56, 32  ;;  %v1641_v40 = vld [vmem:[#allocation2] sm:$0xff]  ;;  %v2332_v59 = vmov 0  }
 0x22c   : > { %v1630_v35 = vsel %vm1439_vm7, %v1592_v17, %v1629_v22  ;;  %v1643_v9 = vld [vmem:[#allocation3] sm:$0xff]  ;;  %v1449_v29 = vsel %vm1441_vm8, %v1412_v24, %v1448_v6  ;;  %v1750_v56 = vld [vmem:[%s2912_s9] sm:$0xff]  ;;  %2295 = vset.pattern.permute.xlu0 %v2332_v59  ;;  %2296 = vset.pattern.permute.xlu1 %v2332_v59 }
 0x22d   : > { %v1631_v39 = vsel %vm1441_vm8, %v1601_v1, %v1630_v35  ;;  %v1645_v61 = vmul.f32 0.0625, %v1643_v9  ;;  %v1453_v30 = vmax.f32 %v1268_v38, %v1449_v29  ;;  %v2254_v3 = vpack.c.bf16 %v1751_v51, %v1750_v56 }
 0x22e   : > { %v1635_v31 = vadd.f32 %v1631_v39, %v1457_v16 }
 0x22f   : > { %v1650_v12 = vsel %vm1649_vm9, %v1641_v40, %v1645_v61  ;;  %1455 = vst.msk [vmem:[#allocation2 + $0x8] sm:$0xff] %vm477_vm1, %v1453_v30  ;;  %2255 = vmatprep.subr.bf16.mxu1 %v2254_v3 }
 0x230   : > { %1637 = vst.msk [vmem:[#allocation3 + $0x8] sm:$0xff] %vm477_vm1, %v1635_v31  ;;  %2212 = vmatprep.mubr.msk.f32.mxu1 %vm477_vm1, %v1650_v12 }
 0x236   : > { %v1642_v13 = vld [vmem:[#allocation2 + $0x8] sm:$0xff] }
 0x237   : > { %v1644_v41 = vld [vmem:[#allocation3 + $0x8] sm:$0xff] }
 0x238   : > { %v1646_v43 = vmul.f32 0.0625, %v1644_v41 }
 0x23a   : > { %v1651_v25 = vsel %vm1649_vm9, %v1642_v13, %v1646_v43 }
 0x23b   : > { %2213 = vmatmul.mubr.msk.f32.vlgmr.msra.gmra.mrb[16].mxu1 %vm477_vm1, %v1651_v25 }
 0x23c   : > { %2257 = vmatpush3.bf16.msra.mxu1 %v2254_v3 }
 0x30e   : > { %v2214_v18 = vpop.f32.mrb[16].mxu1 }
 0x30f   : > { %v1745_v44 = vadd.f32 %v2214_v18, %v2051_v60  ;;  %v1739_v63 = vpop.f32.mrb[17].mxu1 }
 0x310   : > { %v1740_v28 = vadd.f32 %v2051_v60, %v1739_v63 }
 0x311   : > { %v1749_v46 = vmax.f32 %v1745_v44, 0.0 }
 0x312   : > { %v1748_v45 = vmax.f32 %v1740_v28, 0.0 }
 0x314   : > { %2219 = vmatprep.mubr.msk.f32.mxu1 %vm1759_vm10, %v1748_v45 }
 0x315   : > { %2220 = vmatmul.mubr.msk.f32.vlgmr.msra.gmra.mrb[18].mxu1 %vm1759_vm10, %v1749_v46 }
 0x3e8   : > { %v2221_v49 = vpop.f32.mrb[18].mxu1 }
 0x3e9   : > { %v1832_v52 = vpop.f32.mrb[19].mxu1  ;;  %v1838_v42 = vadd.f32 %v2221_v49, %v2054_v50 }
 0x3ea   : > { %v1833_v4 = vadd.f32 %v2054_v50, %v1832_v52 }
 0x3ec   : > { %1843 = vrot.lane.b32.xlu0 %v1833_v4, %s2331_s12 }
 0x3f0   : > { %1845 = vrot.lane.b32.xlu0 %v1838_v42, %s2331_s12 }
 0x45e   : > { %v1844_v26 = vpop.permute.xlu0 %1843 }
 0x45f   : > { %v1849_v10 = vsub.f32 %v1833_v4, %v1844_v26 }
 0x461   : > { %v1853_v48 = vand.u32 2147483647, %v1849_v10  ;;  %v1851_v7 = vmax.f32 %v1849_v10, 0.0 }
 0x462   : > { %v1846_v27 = vpop.permute.xlu0 %1845 }
 0x463   : > { %v1855_v11 = vsub.f32 0.0, %v1853_v48  ;;  %v1850_v55 = vsub.f32 %v1838_v42, %v1846_v27 }
 0x465   : > { %v1857_v58 = vmul.f32 1.442695, %v1855_v11  ;;  %v1854_v53 = vand.u32 2147483647, %v1850_v55  ;;  %v1852_v20 = vmax.f32 %v1850_v55, 0.0 }
 0x467   : > { %2297 = vpow2.f32 %v1857_v58  ;;  %v1856_v54 = vsub.f32 0.0, %v1854_v53 }
 0x469   : > { %v1859_v36 = vmul.f32 1.442695, %v1856_v54 }
 0x46b   : > { %2299 = vpow2.f32 %v1859_v36 }
 0x471   : > { %v2298_v47 = vpop.eup %2297 }
 0x472   : > { %v1861_v33 = vadd.f32 1.0, %v2298_v47 }
 0x474   : > { %2301 = vlog2.f32 %v1861_v33 }
 0x475   : > { %v2300_v62 = vpop.eup %2299 }
 0x476   : > { %v1862_v15 = vadd.f32 1.0, %v2300_v62 }
 0x478   : > { %2303 = vlog2.f32 %v1862_v15 }
 0x47e   : > { %v2302_v2 = vpop.eup %2301 }
 0x47f   : > { %v1864_v23 = vmul.f32 0.6931472, %v2302_v2 }
 0x481   : > { %v1867_v8 = vadd.f32 %v1864_v23, %v1851_v7 }
 0x482   : > { %v2304_v5 = vpop.eup %2303 }
 0x483   : > { %1871 = vrot.lane.b32.xlu1 %v1867_v8, %s2333_s13  ;;  %v1866_v37 = vmul.f32 0.6931472, %v2304_v5 }
 0x485   : > { %v1868_v14 = vadd.f32 %v1866_v37, %v1852_v20 }
 0x487   : > { %1873 = vrot.lane.b32.xlu1 %v1868_v14, %s2333_s13 }
 0x4f5   : > { %v1872_v57 = vpop.permute.xlu1 %1871 }
 0x4f6   : > { %v1877_v0 = vadd.f32 %v1872_v57, %v1833_v4 }
 0x4f8   : > { %1881 = vperm.xlu0 %2295, %v1877_v0  }
 0x4f9   : > { %v1874_v32 = vpop.permute.xlu1 %1873 }
 0x4fa   : > { %v1878_v17 = vadd.f32 %v1874_v32, %v1838_v42 }
 0x4fc   : > { %1886 = vperm.xlu1 %2296, %v1878_v17  }
 0x577   : > { %v1882_v21 = vpop.permute.xlu0 %1881 }
 0x578   : > { %v1889_v19 = vsub.f32 %v1833_v4, %v1882_v21 }
 0x57a   : > { %1892 = vst.msk [vmem:[%s467_s16] sm:$0xff] %vm1891_vm11, %v1889_v19 }
 0x57b   : > { %v1887_v24 = vpop.permute.xlu1 %1886 }
 0x57c   : > { %v1890_v1 = vsub.f32 %v1838_v42, %v1887_v24 }
 0x57e   : > { %1893 = vst.msk [vmem:[%s467_s16 + $0x8] sm:$0xff] %vm1891_vm11, %v1890_v1 }
 0x57f PF: > { %s21_s19 = sadd.s32 1, %s2327_s19   ;;  %s2915_s17 = smov %s2323_s18 }
 0x580   : > { %p18_p5 = scmp.ge.s32.totalorder %s21_s19, 4   ;;  %s2916_s18 = smov %s2918_s20 }
 0x582   :  { %20 = sbr.rel (!%p18_p5) target bundleno = 2 (0x2), region = 105 }

</bundles_post_ra>
